<compile_context>
chip_gen: v5e
topology: v5e:2x2
jax: 0.10.0
libtpu: 0.0.40
codegen_flags: <defaults>
</compile_context>

<pallas_src>
import functools

import jax
import jax.numpy as jnp
import numpy as np
from jax import lax
from jax.experimental import pallas as pl
from jax.experimental.pallas import tpu as pltpu


# ----------------------------- Pallas kernel ------------------------------- #

def fused_lstm_fc_kernel(x_ref, *args, num_layers, seq_len, batch, hidden):
    """Fused multi-layer LSTM + Linear.

    args layout (all full-array VMEM refs):
      [w_ih_0, w_hh_0, b_0, ..., w_ih_{L-1}, w_hh_{L-1}, b_{L-1},
       fc_w, fc_b, out_ref, seq_scratch]
    x_ref is the time-major flattened (padded-batch) input, shape (T*Bpad, D):
    row t*Bpad + b.
    """
    T, B, H = seq_len, batch, hidden
    seq_ref = args[-1]       # VMEM scratch (T*Bpad, H): inter-layer sequence
    out_ref = args[-2]       # (Bpad, O) output
    fc_b_ref = args[-3]      # (1, O)
    fc_w_ref = args[-4]      # (H, O)

    # ---- gate-activation constants: hoisted out of the T*L recurrence ------
    # PyTorch gate order along the 4H lane axis: i, f, g, o ; only g is tanh.
    lane = lax.broadcasted_iota(jnp.int32, (B, 4 * H), 1)
    is_g = jnp.logical_and(lane >= 2 * H, lane < 3 * H)
    # sigmoid(x) = 0.5*tanh(0.5*x) + 0.5  ->  one tanh per step, per-lane scale.
    pre_scale = jnp.where(is_g, jnp.float32(1.0), jnp.float32(0.5))

    h = None
    for layer in range(num_layers):
        w_ih = args[3 * layer][...]       # (D_in, 4H)
        w_hh = args[3 * layer + 1][...]   # (H, 4H)
        bias = args[3 * layer + 2][...]   # (1, 4H)

        # Layer input: raw x for layer 0, VMEM-resident sequence afterwards.
        seq = x_ref[...] if layer == 0 else seq_ref[...]      # (T*Bpad, D_in)

        # Hoisted input projection + bias: ONE MXU matmul for all T steps.
        gx = jnp.dot(seq, w_ih, preferred_element_type=jnp.float32) + bias  # (T*Bpad, 4H)

        h = jnp.zeros((B, H), jnp.float32)
        c = jnp.zeros((B, H), jnp.float32)
        last_layer = (layer + 1 == num_layers)

        # T is small & static -> fully unrolled; only h @ W_hh is serial.
        for t in range(T):
            # Bpad = 8 -> slice starts are sublane-tile aligned (rows 0,8,16,..).
            gates = gx[t * B:(t + 1) * B, :] + jnp.dot(
                h, w_hh, preferred_element_type=jnp.float32)   # (Bpad, 4H)

            # Single full-width tanh + per-lane affine fixup for the sigmoids.
            t_act = jnp.tanh(gates * pre_scale)
            act = jnp.where(is_g, t_act, 0.5 * t_act + 0.5)

            i_g = act[:, 0 * H:1 * H]
            f_g = act[:, 1 * H:2 * H]
            g_g = act[:, 2 * H:3 * H]
            o_g = act[:, 3 * H:4 * H]

            c = f_g * c + i_g * g_g
            h = o_g * jnp.tanh(c)

            if not last_layer:
                # Stash h_t for the next layer's hoisted matmul (stays in VMEM).
                seq_ref[t * B:(t + 1) * B, :] = h

    # Fused final Linear on h(T-1) of the last layer; only (Bpad, O) hits HBM.
    out_ref[...] = (
        jnp.dot(h, fc_w_ref[...], preferred_element_type=jnp.float32)
        + fc_b_ref[...]
    )


# ------------------------------- wrapper ------------------------------------ #

@functools.partial(jax.jit, static_argnames=("num_layers",))
def lstm_model_forward(x_btd, params, num_layers):
    """x_btd: (B, T, D) — PyTorch batch_first layout."""
    B, T, D = x_btd.shape
    H = params["lstm"][0]["w_hh_t"].shape[0]
    O = params["fc"]["w_t"].shape[1]

    # Pad batch to the 8-row sublane tile so every in-kernel per-step slice /
    # store is tile-aligned; slice the result back afterwards.
    Bpad = ((B + 7) // 8) * 8
    x_pad = jnp.pad(x_btd, ((0, Bpad - B), (0, 0), (0, 0)))

    # One tiny time-major flatten outside the kernel so every in-kernel operand
    # is plain 2-D and per-step slices are contiguous sublane rows.
    x_2d = jnp.transpose(x_pad, (1, 0, 2)).reshape(T * Bpad, D)

    flat_inputs = [x_2d]
    for p in params["lstm"]:
        flat_inputs += [p["w_ih_t"], p["w_hh_t"], p["bias"]]
    flat_inputs += [params["fc"]["w_t"], params["fc"]["b"]]

    kernel = functools.partial(
        fused_lstm_fc_kernel,
        num_layers=num_layers, seq_len=T, batch=Bpad, hidden=H)

    vmem_spec = pl.BlockSpec(memory_space=pltpu.MemorySpace.VMEM)
    out_pad = pl.pallas_call(
        kernel,
        out_shape=jax.ShapeDtypeStruct((Bpad, O), jnp.float32),
        in_specs=[vmem_spec] * len(flat_inputs),
        out_specs=vmem_spec,
        scratch_shapes=[pltpu.VMEM((T * Bpad, H), jnp.float32)],
    )(*flat_inputs)
    return out_pad[:B]


# ----------------------- pure-JAX reference (for check) -------------------- #

def lstm_model_reference(x_btd, params, num_layers):
    x_tbd = jnp.transpose(x_btd, (1, 0, 2))
    seq = x_tbd
    for layer in range(num_layers):
        p = params["lstm"][layer]
        H = p["w_hh_t"].shape[0]
        B = seq.shape[1]

        def step(carry, x_t, p=p, H=H):
            h, c = carry
            g = x_t @ p["w_ih_t"] + h @ p["w_hh_t"] + p["bias"]
            i = jax.nn.sigmoid(g[:, :H])
            f = jax.nn.sigmoid(g[:, H:2 * H])
            gg = jnp.tanh(g[:, 2 * H:3 * H])
            o = jax.nn.sigmoid(g[:, 3 * H:4 * H])
            c = f * c + i * gg
            h = o * jnp.tanh(c)
            return (h, c), h

        init = (jnp.zeros((B, H), jnp.float32), jnp.zeros((B, H), jnp.float32))
        _, seq = lax.scan(step, init, seq)
    last = seq[-1]
    return last @ params["fc"]["w_t"] + params["fc"]["b"]


# ------------------------------ params init -------------------------------- #

def init_params(key, input_dim, hidden_dim, num_layers, output_dim):
    params = {"lstm": []}
    k = 1.0 / np.sqrt(hidden_dim)
    for layer in range(num_layers):
        d_in = input_dim if layer == 0 else hidden_dim
        key, k1, k2, k3, k4 = jax.random.split(key, 5)
        w_ih = jax.random.uniform(k1, (4 * hidden_dim, d_in), jnp.float32, -k, k)
        w_hh = jax.random.uniform(k2, (4 * hidden_dim, hidden_dim), jnp.float32, -k, k)
        b_ih = jax.random.uniform(k3, (4 * hidden_dim,), jnp.float32, -k, k)
        b_hh = jax.random.uniform(k4, (4 * hidden_dim,), jnp.float32, -k, k)
        params["lstm"].append({
            "w_ih_t": w_ih.T,                          # (D_in, 4H)
            "w_hh_t": w_hh.T,                          # (H, 4H)
            "bias": (b_ih + b_hh)[None, :],            # (1, 4H)
        })
    kf = 1.0 / np.sqrt(hidden_dim)
    key, k1, k2 = jax.random.split(key, 3)
    w_fc = jax.random.uniform(k1, (output_dim, hidden_dim), jnp.float32, -kf, kf)
    b_fc = jax.random.uniform(k2, (output_dim,), jnp.float32, -kf, kf)
    params["fc"] = {"w_t": w_fc.T, "b": b_fc[None, :]}  # (H, O), (1, O)
    return params


# --------------------------------- main ------------------------------------ #

if __name__ == "__main__":
    B, T = 4, 8
    INPUT_DIM, HIDDEN_DIM, NUM_LAYERS, OUTPUT_DIM = 16, 32, 2, 4

    key = jax.random.PRNGKey(0)
    key, kx, kp = jax.random.split(key, 3)
    x = jax.random.normal(kx, (B, T, INPUT_DIM), jnp.float32)
    params = init_params(kp, INPUT_DIM, HIDDEN_DIM, NUM_LAYERS, OUTPUT_DIM)

    out = lstm_model_forward(x, params, NUM_LAYERS)
    out = jax.block_until_ready(out)

    ref = jax.block_until_ready(lstm_model_reference(x, params, NUM_LAYERS))
    assert out.shape == (B, OUTPUT_DIM)
    np.testing.assert_allclose(np.asarray(out), np.asarray(ref),
                               rtol=1e-4, atol=1e-4)
    print("KERNEL_OK")
</pallas_src>

<mosaic_0001>
module attributes {stable_mosaic.version = 11 : i64} {
  func.func @fused_lstm_fc_kernel(%arg0: memref<64x16xf32, #tpu.memory_space<vmem>>, %arg1: memref<16x128xf32, #tpu.memory_space<vmem>>, %arg2: memref<32x128xf32, #tpu.memory_space<vmem>>, %arg3: memref<1x128xf32, #tpu.memory_space<vmem>>, %arg4: memref<32x128xf32, #tpu.memory_space<vmem>>, %arg5: memref<32x128xf32, #tpu.memory_space<vmem>>, %arg6: memref<1x128xf32, #tpu.memory_space<vmem>>, %arg7: memref<32x4xf32, #tpu.memory_space<vmem>>, %arg8: memref<1x4xf32, #tpu.memory_space<vmem>>, %arg9: memref<8x4xf32, #tpu.memory_space<vmem>>, %arg10: memref<64x32xf32, #tpu.memory_space<vmem>>) attributes {dimension_semantics = [], scalar_prefetch = 0 : i64, scratch_operands = 1 : i64, tpu.core_type = #tpu.core_type<tc>} {
    %0 = tpu.iota {dimensions = array<i32: 1>} : vector<8x128xi32>
    %c64_i32 = arith.constant 64 : i32
    %1 = vector.broadcast %c64_i32 : i32 to vector<8x128xi32>
    %2 = arith.cmpi sge, %0, %1 : vector<8x128xi32>
    %c96_i32 = arith.constant 96 : i32
    %3 = vector.broadcast %c96_i32 : i32 to vector<8x128xi32>
    %4 = arith.cmpi slt, %0, %3 : vector<8x128xi32>
    %5 = arith.andi %2, %4 : vector<8x128xi1>
    %cst = arith.constant 1.000000e+00 : f32
    %cst_0 = arith.constant 5.000000e-01 : f32
    %6 = vector.broadcast %cst : f32 to vector<8x128xf32>
    %7 = vector.broadcast %cst_0 : f32 to vector<8x128xf32>
    %8 = arith.select %5, %6, %7 : vector<8x128xi1>, vector<8x128xf32>
    %c0 = arith.constant 0 : index
    %c0_1 = arith.constant 0 : index
    %9 = vector.load %arg1[%c0, %c0_1] : memref<16x128xf32, #tpu.memory_space<vmem>>, vector<16x128xf32>
    %c0_2 = arith.constant 0 : index
    %c0_3 = arith.constant 0 : index
    %10 = vector.load %arg2[%c0_2, %c0_3] : memref<32x128xf32, #tpu.memory_space<vmem>>, vector<32x128xf32>
    %c0_4 = arith.constant 0 : index
    %c0_5 = arith.constant 0 : index
    %11 = vector.load %arg3[%c0_4, %c0_5] : memref<1x128xf32, #tpu.memory_space<vmem>>, vector<1x128xf32>
    %c0_6 = arith.constant 0 : index
    %c0_7 = arith.constant 0 : index
    %12 = vector.load %arg0[%c0_6, %c0_7] : memref<64x16xf32, #tpu.memory_space<vmem>>, vector<64x16xf32>
    %cst_8 = arith.constant dense<0.000000e+00> : vector<64x128xf32>
    %13 = tpu.matmul %12, %9, %cst_8 {dimension_numbers = #tpu.dot_dimension_numbers<[1], [0], [0], [1], [0, 0, 1, 1], [], []>} : vector<64x16xf32>, vector<16x128xf32>, vector<64x128xf32> -> vector<64x128xf32>
    %14 = vector.broadcast %11 : vector<1x128xf32> to vector<64x128xf32>
    %15 = arith.addf %13, %14 : vector<64x128xf32>
    %cst_9 = arith.constant 0.000000e+00 : f32
    %16 = vector.broadcast %cst_9 : f32 to vector<8x32xf32>
    %cst_10 = arith.constant 0.000000e+00 : f32
    %17 = vector.broadcast %cst_10 : f32 to vector<8x32xf32>
    %18 = vector.extract_strided_slice %15 {offsets = [0, 0], sizes = [8, 128], strides = [1, 1]} : vector<64x128xf32> to vector<8x128xf32>
    %cst_11 = arith.constant dense<0.000000e+00> : vector<8x128xf32>
    %19 = tpu.matmul %16, %10, %cst_11 {dimension_numbers = #tpu.dot_dimension_numbers<[1], [0], [0], [1], [0, 0, 1, 1], [], []>} : vector<8x32xf32>, vector<32x128xf32>, vector<8x128xf32> -> vector<8x128xf32>
    %20 = arith.addf %18, %19 : vector<8x128xf32>
    %21 = arith.mulf %20, %8 : vector<8x128xf32>
    %22 = math.tanh %21 : vector<8x128xf32>
    %cst_12 = arith.constant 5.000000e-01 : f32
    %23 = vector.broadcast %cst_12 : f32 to vector<8x128xf32>
    %24 = arith.mulf %23, %22 : vector<8x128xf32>
    %cst_13 = arith.constant 5.000000e-01 : f32
    %25 = vector.broadcast %cst_13 : f32 to vector<8x128xf32>
    %26 = arith.addf %24, %25 : vector<8x128xf32>
    %27 = arith.select %5, %22, %26 : vector<8x128xi1>, vector<8x128xf32>
    %28 = vector.extract_strided_slice %27 {offsets = [0, 0], sizes = [8, 32], strides = [1, 1]} : vector<8x128xf32> to vector<8x32xf32>
    %29 = vector.extract_strided_slice %27 {offsets = [0, 32], sizes = [8, 32], strides = [1, 1]} : vector<8x128xf32> to vector<8x32xf32>
    %30 = vector.extract_strided_slice %27 {offsets = [0, 64], sizes = [8, 32], strides = [1, 1]} : vector<8x128xf32> to vector<8x32xf32>
    %31 = vector.extract_strided_slice %27 {offsets = [0, 96], sizes = [8, 32], strides = [1, 1]} : vector<8x128xf32> to vector<8x32xf32>
    %32 = arith.mulf %29, %17 : vector<8x32xf32>
    %33 = arith.mulf %28, %30 : vector<8x32xf32>
    %34 = arith.addf %32, %33 : vector<8x32xf32>
    %35 = math.tanh %34 : vector<8x32xf32>
    %36 = arith.mulf %31, %35 : vector<8x32xf32>
    %c0_14 = arith.constant 0 : index
    %c0_15 = arith.constant 0 : index
    %37 = vector.load %arg10[%c0_14, %c0_15] : memref<64x32xf32, #tpu.memory_space<vmem>>, vector<8x32xf32>
    tpu.vector_store %arg10[%c0_14, %c0_15], %36 {strides = array<i32>} : memref<64x32xf32, #tpu.memory_space<vmem>>, vector<8x32xf32>,
    %38 = vector.extract_strided_slice %15 {offsets = [8, 0], sizes = [8, 128], strides = [1, 1]} : vector<64x128xf32> to vector<8x128xf32>
    %cst_16 = arith.constant dense<0.000000e+00> : vector<8x128xf32>
    %39 = tpu.matmul %36, %10, %cst_16 {dimension_numbers = #tpu.dot_dimension_numbers<[1], [0], [0], [1], [0, 0, 1, 1], [], []>} : vector<8x32xf32>, vector<32x128xf32>, vector<8x128xf32> -> vector<8x128xf32>
    %40 = arith.addf %38, %39 : vector<8x128xf32>
    %41 = arith.mulf %40, %8 : vector<8x128xf32>
    %42 = math.tanh %41 : vector<8x128xf32>
    %cst_17 = arith.constant 5.000000e-01 : f32
    %43 = vector.broadcast %cst_17 : f32 to vector<8x128xf32>
    %44 = arith.mulf %43, %42 : vector<8x128xf32>
    %cst_18 = arith.constant 5.000000e-01 : f32
    %45 = vector.broadcast %cst_18 : f32 to vector<8x128xf32>
    %46 = arith.addf %44, %45 : vector<8x128xf32>
    %47 = arith.select %5, %42, %46 : vector<8x128xi1>, vector<8x128xf32>
    %48 = vector.extract_strided_slice %47 {offsets = [0, 0], sizes = [8, 32], strides = [1, 1]} : vector<8x128xf32> to vector<8x32xf32>
    %49 = vector.extract_strided_slice %47 {offsets = [0, 32], sizes = [8, 32], strides = [1, 1]} : vector<8x128xf32> to vector<8x32xf32>
    %50 = vector.extract_strided_slice %47 {offsets = [0, 64], sizes = [8, 32], strides = [1, 1]} : vector<8x128xf32> to vector<8x32xf32>
    %51 = vector.extract_strided_slice %47 {offsets = [0, 96], sizes = [8, 32], strides = [1, 1]} : vector<8x128xf32> to vector<8x32xf32>
    %52 = arith.mulf %49, %34 : vector<8x32xf32>
    %53 = arith.mulf %48, %50 : vector<8x32xf32>
    %54 = arith.addf %52, %53 : vector<8x32xf32>
    %55 = math.tanh %54 : vector<8x32xf32>
    %56 = arith.mulf %51, %55 : vector<8x32xf32>
    %c8 = arith.constant 8 : index
    %c0_19 = arith.constant 0 : index
    %57 = vector.load %arg10[%c8, %c0_19] : memref<64x32xf32, #tpu.memory_space<vmem>>, vector<8x32xf32>
    tpu.vector_store %arg10[%c8, %c0_19], %56 {strides = array<i32>} : memref<64x32xf32, #tpu.memory_space<vmem>>, vector<8x32xf32>,
    %58 = vector.extract_strided_slice %15 {offsets = [16, 0], sizes = [8, 128], strides = [1, 1]} : vector<64x128xf32> to vector<8x128xf32>
    %cst_20 = arith.constant dense<0.000000e+00> : vector<8x128xf32>
    %59 = tpu.matmul %56, %10, %cst_20 {dimension_numbers = #tpu.dot_dimension_numbers<[1], [0], [0], [1], [0, 0, 1, 1], [], []>} : vector<8x32xf32>, vector<32x128xf32>, vector<8x128xf32> -> vector<8x128xf32>
    %60 = arith.addf %58, %59 : vector<8x128xf32>
    %61 = arith.mulf %60, %8 : vector<8x128xf32>
    %62 = math.tanh %61 : vector<8x128xf32>
    %cst_21 = arith.constant 5.000000e-01 : f32
    %63 = vector.broadcast %cst_21 : f32 to vector<8x128xf32>
    %64 = arith.mulf %63, %62 : vector<8x128xf32>
    %cst_22 = arith.constant 5.000000e-01 : f32
    %65 = vector.broadcast %cst_22 : f32 to vector<8x128xf32>
    %66 = arith.addf %64, %65 : vector<8x128xf32>
    %67 = arith.select %5, %62, %66 : vector<8x128xi1>, vector<8x128xf32>
    %68 = vector.extract_strided_slice %67 {offsets = [0, 0], sizes = [8, 32], strides = [1, 1]} : vector<8x128xf32> to vector<8x32xf32>
    %69 = vector.extract_strided_slice %67 {offsets = [0, 32], sizes = [8, 32], strides = [1, 1]} : vector<8x128xf32> to vector<8x32xf32>
    %70 = vector.extract_strided_slice %67 {offsets = [0, 64], sizes = [8, 32], strides = [1, 1]} : vector<8x128xf32> to vector<8x32xf32>
    %71 = vector.extract_strided_slice %67 {offsets = [0, 96], sizes = [8, 32], strides = [1, 1]} : vector<8x128xf32> to vector<8x32xf32>
    %72 = arith.mulf %69, %54 : vector<8x32xf32>
    %73 = arith.mulf %68, %70 : vector<8x32xf32>
    %74 = arith.addf %72, %73 : vector<8x32xf32>
    %75 = math.tanh %74 : vector<8x32xf32>
    %76 = arith.mulf %71, %75 : vector<8x32xf32>
    %c16 = arith.constant 16 : index
    %c0_23 = arith.constant 0 : index
    %77 = vector.load %arg10[%c16, %c0_23] : memref<64x32xf32, #tpu.memory_space<vmem>>, vector<8x32xf32>
    tpu.vector_store %arg10[%c16, %c0_23], %76 {strides = array<i32>} : memref<64x32xf32, #tpu.memory_space<vmem>>, vector<8x32xf32>,
    %78 = vector.extract_strided_slice %15 {offsets = [24, 0], sizes = [8, 128], strides = [1, 1]} : vector<64x128xf32> to vector<8x128xf32>
    %cst_24 = arith.constant dense<0.000000e+00> : vector<8x128xf32>
    %79 = tpu.matmul %76, %10, %cst_24 {dimension_numbers = #tpu.dot_dimension_numbers<[1], [0], [0], [1], [0, 0, 1, 1], [], []>} : vector<8x32xf32>, vector<32x128xf32>, vector<8x128xf32> -> vector<8x128xf32>
    %80 = arith.addf %78, %79 : vector<8x128xf32>
    %81 = arith.mulf %80, %8 : vector<8x128xf32>
    %82 = math.tanh %81 : vector<8x128xf32>
    %cst_25 = arith.constant 5.000000e-01 : f32
    %83 = vector.broadcast %cst_25 : f32 to vector<8x128xf32>
    %84 = arith.mulf %83, %82 : vector<8x128xf32>
    %cst_26 = arith.constant 5.000000e-01 : f32
    %85 = vector.broadcast %cst_26 : f32 to vector<8x128xf32>
    %86 = arith.addf %84, %85 : vector<8x128xf32>
    %87 = arith.select %5, %82, %86 : vector<8x128xi1>, vector<8x128xf32>
    %88 = vector.extract_strided_slice %87 {offsets = [0, 0], sizes = [8, 32], strides = [1, 1]} : vector<8x128xf32> to vector<8x32xf32>
    %89 = vector.extract_strided_slice %87 {offsets = [0, 32], sizes = [8, 32], strides = [1, 1]} : vector<8x128xf32> to vector<8x32xf32>
    %90 = vector.extract_strided_slice %87 {offsets = [0, 64], sizes = [8, 32], strides = [1, 1]} : vector<8x128xf32> to vector<8x32xf32>
    %91 = vector.extract_strided_slice %87 {offsets = [0, 96], sizes = [8, 32], strides = [1, 1]} : vector<8x128xf32> to vector<8x32xf32>
    %92 = arith.mulf %89, %74 : vector<8x32xf32>
    %93 = arith.mulf %88, %90 : vector<8x32xf32>
    %94 = arith.addf %92, %93 : vector<8x32xf32>
    %95 = math.tanh %94 : vector<8x32xf32>
    %96 = arith.mulf %91, %95 : vector<8x32xf32>
    %c24 = arith.constant 24 : index
    %c0_27 = arith.constant 0 : index
    %97 = vector.load %arg10[%c24, %c0_27] : memref<64x32xf32, #tpu.memory_space<vmem>>, vector<8x32xf32>
    tpu.vector_store %arg10[%c24, %c0_27], %96 {strides = array<i32>} : memref<64x32xf32, #tpu.memory_space<vmem>>, vector<8x32xf32>,
    %98 = vector.extract_strided_slice %15 {offsets = [32, 0], sizes = [8, 128], strides = [1, 1]} : vector<64x128xf32> to vector<8x128xf32>
    %cst_28 = arith.constant dense<0.000000e+00> : vector<8x128xf32>
    %99 = tpu.matmul %96, %10, %cst_28 {dimension_numbers = #tpu.dot_dimension_numbers<[1], [0], [0], [1], [0, 0, 1, 1], [], []>} : vector<8x32xf32>, vector<32x128xf32>, vector<8x128xf32> -> vector<8x128xf32>
    %100 = arith.addf %98, %99 : vector<8x128xf32>
    %101 = arith.mulf %100, %8 : vector<8x128xf32>
    %102 = math.tanh %101 : vector<8x128xf32>
    %cst_29 = arith.constant 5.000000e-01 : f32
    %103 = vector.broadcast %cst_29 : f32 to vector<8x128xf32>
    %104 = arith.mulf %103, %102 : vector<8x128xf32>
    %cst_30 = arith.constant 5.000000e-01 : f32
    %105 = vector.broadcast %cst_30 : f32 to vector<8x128xf32>
    %106 = arith.addf %104, %105 : vector<8x128xf32>
    %107 = arith.select %5, %102, %106 : vector<8x128xi1>, vector<8x128xf32>
    %108 = vector.extract_strided_slice %107 {offsets = [0, 0], sizes = [8, 32], strides = [1, 1]} : vector<8x128xf32> to vector<8x32xf32>
    %109 = vector.extract_strided_slice %107 {offsets = [0, 32], sizes = [8, 32], strides = [1, 1]} : vector<8x128xf32> to vector<8x32xf32>
    %110 = vector.extract_strided_slice %107 {offsets = [0, 64], sizes = [8, 32], strides = [1, 1]} : vector<8x128xf32> to vector<8x32xf32>
    %111 = vector.extract_strided_slice %107 {offsets = [0, 96], sizes = [8, 32], strides = [1, 1]} : vector<8x128xf32> to vector<8x32xf32>
    %112 = arith.mulf %109, %94 : vector<8x32xf32>
    %113 = arith.mulf %108, %110 : vector<8x32xf32>
    %114 = arith.addf %112, %113 : vector<8x32xf32>
    %115 = math.tanh %114 : vector<8x32xf32>
    %116 = arith.mulf %111, %115 : vector<8x32xf32>
    %c32 = arith.constant 32 : index
    %c0_31 = arith.constant 0 : index
    %117 = vector.load %arg10[%c32, %c0_31] : memref<64x32xf32, #tpu.memory_space<vmem>>, vector<8x32xf32>
    tpu.vector_store %arg10[%c32, %c0_31], %116 {strides = array<i32>} : memref<64x32xf32, #tpu.memory_space<vmem>>, vector<8x32xf32>,
    %118 = vector.extract_strided_slice %15 {offsets = [40, 0], sizes = [8, 128], strides = [1, 1]} : vector<64x128xf32> to vector<8x128xf32>
    %cst_32 = arith.constant dense<0.000000e+00> : vector<8x128xf32>
    %119 = tpu.matmul %116, %10, %cst_32 {dimension_numbers = #tpu.dot_dimension_numbers<[1], [0], [0], [1], [0, 0, 1, 1], [], []>} : vector<8x32xf32>, vector<32x128xf32>, vector<8x128xf32> -> vector<8x128xf32>
    %120 = arith.addf %118, %119 : vector<8x128xf32>
    %121 = arith.mulf %120, %8 : vector<8x128xf32>
    %122 = math.tanh %121 : vector<8x128xf32>
    %cst_33 = arith.constant 5.000000e-01 : f32
    %123 = vector.broadcast %cst_33 : f32 to vector<8x128xf32>
    %124 = arith.mulf %123, %122 : vector<8x128xf32>
    %cst_34 = arith.constant 5.000000e-01 : f32
    %125 = vector.broadcast %cst_34 : f32 to vector<8x128xf32>
    %126 = arith.addf %124, %125 : vector<8x128xf32>
    %127 = arith.select %5, %122, %126 : vector<8x128xi1>, vector<8x128xf32>
    %128 = vector.extract_strided_slice %127 {offsets = [0, 0], sizes = [8, 32], strides = [1, 1]} : vector<8x128xf32> to vector<8x32xf32>
    %129 = vector.extract_strided_slice %127 {offsets = [0, 32], sizes = [8, 32], strides = [1, 1]} : vector<8x128xf32> to vector<8x32xf32>
    %130 = vector.extract_strided_slice %127 {offsets = [0, 64], sizes = [8, 32], strides = [1, 1]} : vector<8x128xf32> to vector<8x32xf32>
    %131 = vector.extract_strided_slice %127 {offsets = [0, 96], sizes = [8, 32], strides = [1, 1]} : vector<8x128xf32> to vector<8x32xf32>
    %132 = arith.mulf %129, %114 : vector<8x32xf32>
    %133 = arith.mulf %128, %130 : vector<8x32xf32>
    %134 = arith.addf %132, %133 : vector<8x32xf32>
    %135 = math.tanh %134 : vector<8x32xf32>
    %136 = arith.mulf %131, %135 : vector<8x32xf32>
    %c40 = arith.constant 40 : index
    %c0_35 = arith.constant 0 : index
    %137 = vector.load %arg10[%c40, %c0_35] : memref<64x32xf32, #tpu.memory_space<vmem>>, vector<8x32xf32>
    tpu.vector_store %arg10[%c40, %c0_35], %136 {strides = array<i32>} : memref<64x32xf32, #tpu.memory_space<vmem>>, vector<8x32xf32>,
    %138 = vector.extract_strided_slice %15 {offsets = [48, 0], sizes = [8, 128], strides = [1, 1]} : vector<64x128xf32> to vector<8x128xf32>
    %cst_36 = arith.constant dense<0.000000e+00> : vector<8x128xf32>
    %139 = tpu.matmul %136, %10, %cst_36 {dimension_numbers = #tpu.dot_dimension_numbers<[1], [0], [0], [1], [0, 0, 1, 1], [], []>} : vector<8x32xf32>, vector<32x128xf32>, vector<8x128xf32> -> vector<8x128xf32>
    %140 = arith.addf %138, %139 : vector<8x128xf32>
    %141 = arith.mulf %140, %8 : vector<8x128xf32>
    %142 = math.tanh %141 : vector<8x128xf32>
    %cst_37 = arith.constant 5.000000e-01 : f32
    %143 = vector.broadcast %cst_37 : f32 to vector<8x128xf32>
    %144 = arith.mulf %143, %142 : vector<8x128xf32>
    %cst_38 = arith.constant 5.000000e-01 : f32
    %145 = vector.broadcast %cst_38 : f32 to vector<8x128xf32>
    %146 = arith.addf %144, %145 : vector<8x128xf32>
    %147 = arith.select %5, %142, %146 : vector<8x128xi1>, vector<8x128xf32>
    %148 = vector.extract_strided_slice %147 {offsets = [0, 0], sizes = [8, 32], strides = [1, 1]} : vector<8x128xf32> to vector<8x32xf32>
    %149 = vector.extract_strided_slice %147 {offsets = [0, 32], sizes = [8, 32], strides = [1, 1]} : vector<8x128xf32> to vector<8x32xf32>
    %150 = vector.extract_strided_slice %147 {offsets = [0, 64], sizes = [8, 32], strides = [1, 1]} : vector<8x128xf32> to vector<8x32xf32>
    %151 = vector.extract_strided_slice %147 {offsets = [0, 96], sizes = [8, 32], strides = [1, 1]} : vector<8x128xf32> to vector<8x32xf32>
    %152 = arith.mulf %149, %134 : vector<8x32xf32>
    %153 = arith.mulf %148, %150 : vector<8x32xf32>
    %154 = arith.addf %152, %153 : vector<8x32xf32>
    %155 = math.tanh %154 : vector<8x32xf32>
    %156 = arith.mulf %151, %155 : vector<8x32xf32>
    %c48 = arith.constant 48 : index
    %c0_39 = arith.constant 0 : index
    %157 = vector.load %arg10[%c48, %c0_39] : memref<64x32xf32, #tpu.memory_space<vmem>>, vector<8x32xf32>
    tpu.vector_store %arg10[%c48, %c0_39], %156 {strides = array<i32>} : memref<64x32xf32, #tpu.memory_space<vmem>>, vector<8x32xf32>,
    %158 = vector.extract_strided_slice %15 {offsets = [56, 0], sizes = [8, 128], strides = [1, 1]} : vector<64x128xf32> to vector<8x128xf32>
    %cst_40 = arith.constant dense<0.000000e+00> : vector<8x128xf32>
    %159 = tpu.matmul %156, %10, %cst_40 {dimension_numbers = #tpu.dot_dimension_numbers<[1], [0], [0], [1], [0, 0, 1, 1], [], []>} : vector<8x32xf32>, vector<32x128xf32>, vector<8x128xf32> -> vector<8x128xf32>
    %160 = arith.addf %158, %159 : vector<8x128xf32>
    %161 = arith.mulf %160, %8 : vector<8x128xf32>
    %162 = math.tanh %161 : vector<8x128xf32>
    %cst_41 = arith.constant 5.000000e-01 : f32
    %163 = vector.broadcast %cst_41 : f32 to vector<8x128xf32>
    %164 = arith.mulf %163, %162 : vector<8x128xf32>
    %cst_42 = arith.constant 5.000000e-01 : f32
    %165 = vector.broadcast %cst_42 : f32 to vector<8x128xf32>
    %166 = arith.addf %164, %165 : vector<8x128xf32>
    %167 = arith.select %5, %162, %166 : vector<8x128xi1>, vector<8x128xf32>
    %168 = vector.extract_strided_slice %167 {offsets = [0, 0], sizes = [8, 32], strides = [1, 1]} : vector<8x128xf32> to vector<8x32xf32>
    %169 = vector.extract_strided_slice %167 {offsets = [0, 32], sizes = [8, 32], strides = [1, 1]} : vector<8x128xf32> to vector<8x32xf32>
    %170 = vector.extract_strided_slice %167 {offsets = [0, 64], sizes = [8, 32], strides = [1, 1]} : vector<8x128xf32> to vector<8x32xf32>
    %171 = vector.extract_strided_slice %167 {offsets = [0, 96], sizes = [8, 32], strides = [1, 1]} : vector<8x128xf32> to vector<8x32xf32>
    %172 = arith.mulf %169, %154 : vector<8x32xf32>
    %173 = arith.mulf %168, %170 : vector<8x32xf32>
    %174 = arith.addf %172, %173 : vector<8x32xf32>
    %175 = math.tanh %174 : vector<8x32xf32>
    %176 = arith.mulf %171, %175 : vector<8x32xf32>
    %c56 = arith.constant 56 : index
    %c0_43 = arith.constant 0 : index
    %177 = vector.load %arg10[%c56, %c0_43] : memref<64x32xf32, #tpu.memory_space<vmem>>, vector<8x32xf32>
    tpu.vector_store %arg10[%c56, %c0_43], %176 {strides = array<i32>} : memref<64x32xf32, #tpu.memory_space<vmem>>, vector<8x32xf32>,
    %c0_44 = arith.constant 0 : index
    %c0_45 = arith.constant 0 : index
    %178 = vector.load %arg4[%c0_44, %c0_45] : memref<32x128xf32, #tpu.memory_space<vmem>>, vector<32x128xf32>
    %c0_46 = arith.constant 0 : index
    %c0_47 = arith.constant 0 : index
    %179 = vector.load %arg5[%c0_46, %c0_47] : memref<32x128xf32, #tpu.memory_space<vmem>>, vector<32x128xf32>
    %c0_48 = arith.constant 0 : index
    %c0_49 = arith.constant 0 : index
    %180 = vector.load %arg6[%c0_48, %c0_49] : memref<1x128xf32, #tpu.memory_space<vmem>>, vector<1x128xf32>
    %c0_50 = arith.constant 0 : index
    %c0_51 = arith.constant 0 : index
    %181 = vector.load %arg10[%c0_50, %c0_51] : memref<64x32xf32, #tpu.memory_space<vmem>>, vector<64x32xf32>
    %cst_52 = arith.constant dense<0.000000e+00> : vector<64x128xf32>
    %182 = tpu.matmul %181, %178, %cst_52 {dimension_numbers = #tpu.dot_dimension_numbers<[1], [0], [0], [1], [0, 0, 1, 1], [], []>} : vector<64x32xf32>, vector<32x128xf32>, vector<64x128xf32> -> vector<64x128xf32>
    %183 = vector.broadcast %180 : vector<1x128xf32> to vector<64x128xf32>
    %184 = arith.addf %182, %183 : vector<64x128xf32>
    %cst_53 = arith.constant 0.000000e+00 : f32
    %185 = vector.broadcast %cst_53 : f32 to vector<8x32xf32>
    %cst_54 = arith.constant 0.000000e+00 : f32
    %186 = vector.broadcast %cst_54 : f32 to vector<8x32xf32>
    %187 = vector.extract_strided_slice %184 {offsets = [0, 0], sizes = [8, 128], strides = [1, 1]} : vector<64x128xf32> to vector<8x128xf32>
    %cst_55 = arith.constant dense<0.000000e+00> : vector<8x128xf32>
    %188 = tpu.matmul %185, %179, %cst_55 {dimension_numbers = #tpu.dot_dimension_numbers<[1], [0], [0], [1], [0, 0, 1, 1], [], []>} : vector<8x32xf32>, vector<32x128xf32>, vector<8x128xf32> -> vector<8x128xf32>
    %189 = arith.addf %187, %188 : vector<8x128xf32>
    %190 = arith.mulf %189, %8 : vector<8x128xf32>
    %191 = math.tanh %190 : vector<8x128xf32>
    %cst_56 = arith.constant 5.000000e-01 : f32
    %192 = vector.broadcast %cst_56 : f32 to vector<8x128xf32>
    %193 = arith.mulf %192, %191 : vector<8x128xf32>
    %cst_57 = arith.constant 5.000000e-01 : f32
    %194 = vector.broadcast %cst_57 : f32 to vector<8x128xf32>
    %195 = arith.addf %193, %194 : vector<8x128xf32>
    %196 = arith.select %5, %191, %195 : vector<8x128xi1>, vector<8x128xf32>
    %197 = vector.extract_strided_slice %196 {offsets = [0, 0], sizes = [8, 32], strides = [1, 1]} : vector<8x128xf32> to vector<8x32xf32>
    %198 = vector.extract_strided_slice %196 {offsets = [0, 32], sizes = [8, 32], strides = [1, 1]} : vector<8x128xf32> to vector<8x32xf32>
    %199 = vector.extract_strided_slice %196 {offsets = [0, 64], sizes = [8, 32], strides = [1, 1]} : vector<8x128xf32> to vector<8x32xf32>
    %200 = vector.extract_strided_slice %196 {offsets = [0, 96], sizes = [8, 32], strides = [1, 1]} : vector<8x128xf32> to vector<8x32xf32>
    %201 = arith.mulf %198, %186 : vector<8x32xf32>
    %202 = arith.mulf %197, %199 : vector<8x32xf32>
    %203 = arith.addf %201, %202 : vector<8x32xf32>
    %204 = math.tanh %203 : vector<8x32xf32>
    %205 = arith.mulf %200, %204 : vector<8x32xf32>
    %206 = vector.extract_strided_slice %184 {offsets = [8, 0], sizes = [8, 128], strides = [1, 1]} : vector<64x128xf32> to vector<8x128xf32>
    %cst_58 = arith.constant dense<0.000000e+00> : vector<8x128xf32>
    %207 = tpu.matmul %205, %179, %cst_58 {dimension_numbers = #tpu.dot_dimension_numbers<[1], [0], [0], [1], [0, 0, 1, 1], [], []>} : vector<8x32xf32>, vector<32x128xf32>, vector<8x128xf32> -> vector<8x128xf32>
    %208 = arith.addf %206, %207 : vector<8x128xf32>
    %209 = arith.mulf %208, %8 : vector<8x128xf32>
    %210 = math.tanh %209 : vector<8x128xf32>
    %cst_59 = arith.constant 5.000000e-01 : f32
    %211 = vector.broadcast %cst_59 : f32 to vector<8x128xf32>
    %212 = arith.mulf %211, %210 : vector<8x128xf32>
    %cst_60 = arith.constant 5.000000e-01 : f32
    %213 = vector.broadcast %cst_60 : f32 to vector<8x128xf32>
    %214 = arith.addf %212, %213 : vector<8x128xf32>
    %215 = arith.select %5, %210, %214 : vector<8x128xi1>, vector<8x128xf32>
    %216 = vector.extract_strided_slice %215 {offsets = [0, 0], sizes = [8, 32], strides = [1, 1]} : vector<8x128xf32> to vector<8x32xf32>
    %217 = vector.extract_strided_slice %215 {offsets = [0, 32], sizes = [8, 32], strides = [1, 1]} : vector<8x128xf32> to vector<8x32xf32>
    %218 = vector.extract_strided_slice %215 {offsets = [0, 64], sizes = [8, 32], strides = [1, 1]} : vector<8x128xf32> to vector<8x32xf32>
    %219 = vector.extract_strided_slice %215 {offsets = [0, 96], sizes = [8, 32], strides = [1, 1]} : vector<8x128xf32> to vector<8x32xf32>
    %220 = arith.mulf %217, %203 : vector<8x32xf32>
    %221 = arith.mulf %216, %218 : vector<8x32xf32>
    %222 = arith.addf %220, %221 : vector<8x32xf32>
    %223 = math.tanh %222 : vector<8x32xf32>
    %224 = arith.mulf %219, %223 : vector<8x32xf32>
    %225 = vector.extract_strided_slice %184 {offsets = [16, 0], sizes = [8, 128], strides = [1, 1]} : vector<64x128xf32> to vector<8x128xf32>
    %cst_61 = arith.constant dense<0.000000e+00> : vector<8x128xf32>
    %226 = tpu.matmul %224, %179, %cst_61 {dimension_numbers = #tpu.dot_dimension_numbers<[1], [0], [0], [1], [0, 0, 1, 1], [], []>} : vector<8x32xf32>, vector<32x128xf32>, vector<8x128xf32> -> vector<8x128xf32>
    %227 = arith.addf %225, %226 : vector<8x128xf32>
    %228 = arith.mulf %227, %8 : vector<8x128xf32>
    %229 = math.tanh %228 : vector<8x128xf32>
    %cst_62 = arith.constant 5.000000e-01 : f32
    %230 = vector.broadcast %cst_62 : f32 to vector<8x128xf32>
    %231 = arith.mulf %230, %229 : vector<8x128xf32>
    %cst_63 = arith.constant 5.000000e-01 : f32
    %232 = vector.broadcast %cst_63 : f32 to vector<8x128xf32>
    %233 = arith.addf %231, %232 : vector<8x128xf32>
    %234 = arith.select %5, %229, %233 : vector<8x128xi1>, vector<8x128xf32>
    %235 = vector.extract_strided_slice %234 {offsets = [0, 0], sizes = [8, 32], strides = [1, 1]} : vector<8x128xf32> to vector<8x32xf32>
    %236 = vector.extract_strided_slice %234 {offsets = [0, 32], sizes = [8, 32], strides = [1, 1]} : vector<8x128xf32> to vector<8x32xf32>
    %237 = vector.extract_strided_slice %234 {offsets = [0, 64], sizes = [8, 32], strides = [1, 1]} : vector<8x128xf32> to vector<8x32xf32>
    %238 = vector.extract_strided_slice %234 {offsets = [0, 96], sizes = [8, 32], strides = [1, 1]} : vector<8x128xf32> to vector<8x32xf32>
    %239 = arith.mulf %236, %222 : vector<8x32xf32>
    %240 = arith.mulf %235, %237 : vector<8x32xf32>
    %241 = arith.addf %239, %240 : vector<8x32xf32>
    %242 = math.tanh %241 : vector<8x32xf32>
    %243 = arith.mulf %238, %242 : vector<8x32xf32>
    %244 = vector.extract_strided_slice %184 {offsets = [24, 0], sizes = [8, 128], strides = [1, 1]} : vector<64x128xf32> to vector<8x128xf32>
    %cst_64 = arith.constant dense<0.000000e+00> : vector<8x128xf32>
    %245 = tpu.matmul %243, %179, %cst_64 {dimension_numbers = #tpu.dot_dimension_numbers<[1], [0], [0], [1], [0, 0, 1, 1], [], []>} : vector<8x32xf32>, vector<32x128xf32>, vector<8x128xf32> -> vector<8x128xf32>
    %246 = arith.addf %244, %245 : vector<8x128xf32>
    %247 = arith.mulf %246, %8 : vector<8x128xf32>
    %248 = math.tanh %247 : vector<8x128xf32>
    %cst_65 = arith.constant 5.000000e-01 : f32
    %249 = vector.broadcast %cst_65 : f32 to vector<8x128xf32>
    %250 = arith.mulf %249, %248 : vector<8x128xf32>
    %cst_66 = arith.constant 5.000000e-01 : f32
    %251 = vector.broadcast %cst_66 : f32 to vector<8x128xf32>
    %252 = arith.addf %250, %251 : vector<8x128xf32>
    %253 = arith.select %5, %248, %252 : vector<8x128xi1>, vector<8x128xf32>
    %254 = vector.extract_strided_slice %253 {offsets = [0, 0], sizes = [8, 32], strides = [1, 1]} : vector<8x128xf32> to vector<8x32xf32>
    %255 = vector.extract_strided_slice %253 {offsets = [0, 32], sizes = [8, 32], strides = [1, 1]} : vector<8x128xf32> to vector<8x32xf32>
    %256 = vector.extract_strided_slice %253 {offsets = [0, 64], sizes = [8, 32], strides = [1, 1]} : vector<8x128xf32> to vector<8x32xf32>
    %257 = vector.extract_strided_slice %253 {offsets = [0, 96], sizes = [8, 32], strides = [1, 1]} : vector<8x128xf32> to vector<8x32xf32>
    %258 = arith.mulf %255, %241 : vector<8x32xf32>
    %259 = arith.mulf %254, %256 : vector<8x32xf32>
    %260 = arith.addf %258, %259 : vector<8x32xf32>
    %261 = math.tanh %260 : vector<8x32xf32>
    %262 = arith.mulf %257, %261 : vector<8x32xf32>
    %263 = vector.extract_strided_slice %184 {offsets = [32, 0], sizes = [8, 128], strides = [1, 1]} : vector<64x128xf32> to vector<8x128xf32>
    %cst_67 = arith.constant dense<0.000000e+00> : vector<8x128xf32>
    %264 = tpu.matmul %262, %179, %cst_67 {dimension_numbers = #tpu.dot_dimension_numbers<[1], [0], [0], [1], [0, 0, 1, 1], [], []>} : vector<8x32xf32>, vector<32x128xf32>, vector<8x128xf32> -> vector<8x128xf32>
    %265 = arith.addf %263, %264 : vector<8x128xf32>
    %266 = arith.mulf %265, %8 : vector<8x128xf32>
    %267 = math.tanh %266 : vector<8x128xf32>
    %cst_68 = arith.constant 5.000000e-01 : f32
    %268 = vector.broadcast %cst_68 : f32 to vector<8x128xf32>
    %269 = arith.mulf %268, %267 : vector<8x128xf32>
    %cst_69 = arith.constant 5.000000e-01 : f32
    %270 = vector.broadcast %cst_69 : f32 to vector<8x128xf32>
    %271 = arith.addf %269, %270 : vector<8x128xf32>
    %272 = arith.select %5, %267, %271 : vector<8x128xi1>, vector<8x128xf32>
    %273 = vector.extract_strided_slice %272 {offsets = [0, 0], sizes = [8, 32], strides = [1, 1]} : vector<8x128xf32> to vector<8x32xf32>
    %274 = vector.extract_strided_slice %272 {offsets = [0, 32], sizes = [8, 32], strides = [1, 1]} : vector<8x128xf32> to vector<8x32xf32>
    %275 = vector.extract_strided_slice %272 {offsets = [0, 64], sizes = [8, 32], strides = [1, 1]} : vector<8x128xf32> to vector<8x32xf32>
    %276 = vector.extract_strided_slice %272 {offsets = [0, 96], sizes = [8, 32], strides = [1, 1]} : vector<8x128xf32> to vector<8x32xf32>
    %277 = arith.mulf %274, %260 : vector<8x32xf32>
    %278 = arith.mulf %273, %275 : vector<8x32xf32>
    %279 = arith.addf %277, %278 : vector<8x32xf32>
    %280 = math.tanh %279 : vector<8x32xf32>
    %281 = arith.mulf %276, %280 : vector<8x32xf32>
    %282 = vector.extract_strided_slice %184 {offsets = [40, 0], sizes = [8, 128], strides = [1, 1]} : vector<64x128xf32> to vector<8x128xf32>
    %cst_70 = arith.constant dense<0.000000e+00> : vector<8x128xf32>
    %283 = tpu.matmul %281, %179, %cst_70 {dimension_numbers = #tpu.dot_dimension_numbers<[1], [0], [0], [1], [0, 0, 1, 1], [], []>} : vector<8x32xf32>, vector<32x128xf32>, vector<8x128xf32> -> vector<8x128xf32>
    %284 = arith.addf %282, %283 : vector<8x128xf32>
    %285 = arith.mulf %284, %8 : vector<8x128xf32>
    %286 = math.tanh %285 : vector<8x128xf32>
    %cst_71 = arith.constant 5.000000e-01 : f32
    %287 = vector.broadcast %cst_71 : f32 to vector<8x128xf32>
    %288 = arith.mulf %287, %286 : vector<8x128xf32>
    %cst_72 = arith.constant 5.000000e-01 : f32
    %289 = vector.broadcast %cst_72 : f32 to vector<8x128xf32>
    %290 = arith.addf %288, %289 : vector<8x128xf32>
    %291 = arith.select %5, %286, %290 : vector<8x128xi1>, vector<8x128xf32>
    %292 = vector.extract_strided_slice %291 {offsets = [0, 0], sizes = [8, 32], strides = [1, 1]} : vector<8x128xf32> to vector<8x32xf32>
    %293 = vector.extract_strided_slice %291 {offsets = [0, 32], sizes = [8, 32], strides = [1, 1]} : vector<8x128xf32> to vector<8x32xf32>
    %294 = vector.extract_strided_slice %291 {offsets = [0, 64], sizes = [8, 32], strides = [1, 1]} : vector<8x128xf32> to vector<8x32xf32>
    %295 = vector.extract_strided_slice %291 {offsets = [0, 96], sizes = [8, 32], strides = [1, 1]} : vector<8x128xf32> to vector<8x32xf32>
    %296 = arith.mulf %293, %279 : vector<8x32xf32>
    %297 = arith.mulf %292, %294 : vector<8x32xf32>
    %298 = arith.addf %296, %297 : vector<8x32xf32>
    %299 = math.tanh %298 : vector<8x32xf32>
    %300 = arith.mulf %295, %299 : vector<8x32xf32>
    %301 = vector.extract_strided_slice %184 {offsets = [48, 0], sizes = [8, 128], strides = [1, 1]} : vector<64x128xf32> to vector<8x128xf32>
    %cst_73 = arith.constant dense<0.000000e+00> : vector<8x128xf32>
    %302 = tpu.matmul %300, %179, %cst_73 {dimension_numbers = #tpu.dot_dimension_numbers<[1], [0], [0], [1], [0, 0, 1, 1], [], []>} : vector<8x32xf32>, vector<32x128xf32>, vector<8x128xf32> -> vector<8x128xf32>
    %303 = arith.addf %301, %302 : vector<8x128xf32>
    %304 = arith.mulf %303, %8 : vector<8x128xf32>
    %305 = math.tanh %304 : vector<8x128xf32>
    %cst_74 = arith.constant 5.000000e-01 : f32
    %306 = vector.broadcast %cst_74 : f32 to vector<8x128xf32>
    %307 = arith.mulf %306, %305 : vector<8x128xf32>
    %cst_75 = arith.constant 5.000000e-01 : f32
    %308 = vector.broadcast %cst_75 : f32 to vector<8x128xf32>
    %309 = arith.addf %307, %308 : vector<8x128xf32>
    %310 = arith.select %5, %305, %309 : vector<8x128xi1>, vector<8x128xf32>
    %311 = vector.extract_strided_slice %310 {offsets = [0, 0], sizes = [8, 32], strides = [1, 1]} : vector<8x128xf32> to vector<8x32xf32>
    %312 = vector.extract_strided_slice %310 {offsets = [0, 32], sizes = [8, 32], strides = [1, 1]} : vector<8x128xf32> to vector<8x32xf32>
    %313 = vector.extract_strided_slice %310 {offsets = [0, 64], sizes = [8, 32], strides = [1, 1]} : vector<8x128xf32> to vector<8x32xf32>
    %314 = vector.extract_strided_slice %310 {offsets = [0, 96], sizes = [8, 32], strides = [1, 1]} : vector<8x128xf32> to vector<8x32xf32>
    %315 = arith.mulf %312, %298 : vector<8x32xf32>
    %316 = arith.mulf %311, %313 : vector<8x32xf32>
    %317 = arith.addf %315, %316 : vector<8x32xf32>
    %318 = math.tanh %317 : vector<8x32xf32>
    %319 = arith.mulf %314, %318 : vector<8x32xf32>
    %320 = vector.extract_strided_slice %184 {offsets = [56, 0], sizes = [8, 128], strides = [1, 1]} : vector<64x128xf32> to vector<8x128xf32>
    %cst_76 = arith.constant dense<0.000000e+00> : vector<8x128xf32>
    %321 = tpu.matmul %319, %179, %cst_76 {dimension_numbers = #tpu.dot_dimension_numbers<[1], [0], [0], [1], [0, 0, 1, 1], [], []>} : vector<8x32xf32>, vector<32x128xf32>, vector<8x128xf32> -> vector<8x128xf32>
    %322 = arith.addf %320, %321 : vector<8x128xf32>
    %323 = arith.mulf %322, %8 : vector<8x128xf32>
    %324 = math.tanh %323 : vector<8x128xf32>
    %cst_77 = arith.constant 5.000000e-01 : f32
    %325 = vector.broadcast %cst_77 : f32 to vector<8x128xf32>
    %326 = arith.mulf %325, %324 : vector<8x128xf32>
    %cst_78 = arith.constant 5.000000e-01 : f32
    %327 = vector.broadcast %cst_78 : f32 to vector<8x128xf32>
    %328 = arith.addf %326, %327 : vector<8x128xf32>
    %329 = arith.select %5, %324, %328 : vector<8x128xi1>, vector<8x128xf32>
    %330 = vector.extract_strided_slice %329 {offsets = [0, 0], sizes = [8, 32], strides = [1, 1]} : vector<8x128xf32> to vector<8x32xf32>
    %331 = vector.extract_strided_slice %329 {offsets = [0, 32], sizes = [8, 32], strides = [1, 1]} : vector<8x128xf32> to vector<8x32xf32>
    %332 = vector.extract_strided_slice %329 {offsets = [0, 64], sizes = [8, 32], strides = [1, 1]} : vector<8x128xf32> to vector<8x32xf32>
    %333 = vector.extract_strided_slice %329 {offsets = [0, 96], sizes = [8, 32], strides = [1, 1]} : vector<8x128xf32> to vector<8x32xf32>
    %334 = arith.mulf %331, %317 : vector<8x32xf32>
    %335 = arith.mulf %330, %332 : vector<8x32xf32>
    %336 = arith.addf %334, %335 : vector<8x32xf32>
    %337 = math.tanh %336 : vector<8x32xf32>
    %338 = arith.mulf %333, %337 : vector<8x32xf32>
    %c0_79 = arith.constant 0 : index
    %c0_80 = arith.constant 0 : index
    %339 = vector.load %arg7[%c0_79, %c0_80] : memref<32x4xf32, #tpu.memory_space<vmem>>, vector<32x4xf32>
    %cst_81 = arith.constant dense<0.000000e+00> : vector<8x4xf32>
    %340 = tpu.matmul %338, %339, %cst_81 {dimension_numbers = #tpu.dot_dimension_numbers<[1], [0], [0], [1], [0, 0, 1, 1], [], []>} : vector<8x32xf32>, vector<32x4xf32>, vector<8x4xf32> -> vector<8x4xf32>
    %c0_82 = arith.constant 0 : index
    %c0_83 = arith.constant 0 : index
    %341 = vector.load %arg8[%c0_82, %c0_83] : memref<1x4xf32, #tpu.memory_space<vmem>>, vector<1x4xf32>
    %342 = vector.broadcast %341 : vector<1x4xf32> to vector<8x4xf32>
    %343 = arith.addf %340, %342 : vector<8x4xf32>
    %c0_84 = arith.constant 0 : index
    %c0_85 = arith.constant 0 : index
    %344 = vector.load %arg9[%c0_84, %c0_85] : memref<8x4xf32, #tpu.memory_space<vmem>>, vector<8x4xf32>
    tpu.vector_store %arg9[%c0_84, %c0_85], %343 {strides = array<i32>} : memref<8x4xf32, #tpu.memory_space<vmem>>, vector<8x4xf32>,
    return
  }
}

</mosaic_0001>

<bundles_post_ra>
// kernel: lstm_model_forward.1
= control target key start
LH: loop header
LB: loop body
LE: loop exit
PB: predicated region body
PF: predicated region fallthrough
CT: control target
= control target key end

     0   :  { %vm56_vm0 = vcmask 130048   ;;  %v1129_v7 = vmov 0.0   ;;  %v32_v8 = vlaneseq  ;;  %v1130_v14 = vmov 0.5   ;;  %s1132_s23 = smov 32   ;;  %s1544_s2 = inlined_call_operand.vmem [shape: f32[32,128], index: 2, kind: input, shape index: {}]   ;;  %s1545_s1 = inlined_call_operand.vmem [shape: f32[16,128], index: 1, kind: input, shape index: {}]   ;;  %s1546_s0 = inlined_call_operand.vmem [shape: f32[64,16], index: 0, kind: input, shape index: {}]   ;;  %s1547_s3 = inlined_call_operand.vmem [shape: f32[1,128], index: 3, kind: input, shape index: {}]   ;;  %s1548_s4 = inlined_call_operand.vmem [shape: f32[32,128], index: 4, kind: input, shape index: {}]   ;;  %s1549_s6 = inlined_call_operand.vmem [shape: f32[1,128], index: 6, kind: input, shape index: {}]   ;;  %s1550_s5 = inlined_call_operand.vmem [shape: f32[32,128], index: 5, kind: input, shape index: {}]   ;;  %s1551_s7 = inlined_call_operand.vmem [shape: f32[32,4], index: 7, kind: input, shape index: {}]   ;;  %s1552_s8 = inlined_call_operand.vmem [shape: f32[1,4], index: 8, kind: input, shape index: {}]   ;;  %s1553_s9 = inlined_call_operand.vmem [shape: f32[8,4], index: 9, kind: output, shape index: {}]  }
   0x1   :  { %v1186_v0 = vld [vmem:[%s1544_s2 + $0x18] sm:$0xff]  ;;  %v39_v1 = vld [vmem:[%s1545_s1 + $0x8] sm:$0xff]  ;;  %v1194_v2 = vld [vmem:[%s1544_s2 + $0x10] sm:$0xff]  ;;  %vm122_vm4 = vcmask 261120   ;;  %vm1021_vm5 = vcmask 31744  }
   0x2   :  { %138 = vmatpush.msra.mxu1 %v1186_v0  ;;  %95 = vmatpush.msra.mxu0 %v39_v1  ;;  %v38_v3 = vld [vmem:[%s1545_s1] sm:$0xff]  ;;  %v1206_v5 = vld [vmem:[%s1544_s2 + $0x8] sm:$0xff]  ;;  %v33_v9 = vand.u32 127, %v32_v8  ;;  %v527_v31 = vld [vmem:[%s1548_s4 + $0x18] sm:$0xff] }
   0x3   :  { %v45_v4 = vld [vmem:[%s1546_s0] sm:$0xff]  ;;  %188 = vmatpush.msra.mxu2 %v1186_v0  ;;  %v526_v32 = vld [vmem:[%s1548_s4 + $0x10] sm:$0xff]  ;;  %v46_v33 = vld [vmem:[%s1546_s0 + $0x8] sm:$0xff]  ;;  %580 = vmatpush.msra.mxu3 %v527_v31 }
   0x4   :  { %139 = vmatpush.msra.mxu1 %v1194_v2  ;;  %96 = vmatpush.msra.mxu0 %v38_v3  ;;  %v1214_v6 = vld [vmem:[%s1544_s2] sm:$0xff]  ;;  %vm34_vm1 = vcmp.ge.s32.totalorder %v33_v9, 64  ;;  %vm35_vm2 = vcmp.lt.s32.totalorder %v33_v9, 96  ;;  %v525_v34 = vld [vmem:[%s1548_s4 + $0x8] sm:$0xff]  ;;  %v47_v55 = vld [vmem:[%s1546_s0 + $0x10] sm:$0xff] }
   0x5   :  { %1027 = vmatmul.msk.f32.vlgmr.msra.gmra.mxu0 %vm56_vm0, %v45_v4  ;;  %189 = vmatpush.msra.mxu2 %v1194_v2  ;;  %v1241_v10 = vld [vmem:[%s1547_s3] ss:$0 sm:$0xff]  ;;  %vm1244_vm3 = vmand %vm34_vm1, %vm35_vm2  ;;  %s1131_s3 = smov 64   ;;  %v990_v13 = vld [vmem:[%s1551_s7 + $0x10] sm:$0xff] }
   0x6   :  { %140 = vmatpush.msra.mxu1 %v1206_v5  ;;  %388 = vmatpush.msrb.mxu0 %v1186_v0  ;;  %v1250_v15 = vsel %vm1244_vm3, 1.0, %v1130_v14  ;;  %v524_v35 = vld [vmem:[%s1548_s4] sm:$0xff] }
   0x7   :  { %190 = vmatpush.msra.mxu2 %v1206_v5  ;;  %581 = vmatpush.msra.mxu3 %v526_v32 }
   0x8   :  { %141 = vmatpush.msra.mxu1 %v1214_v6  ;;  %389 = vmatpush.msrb.mxu0 %v1194_v2 }
   0x9   :  { %142 = vmatmul.f32.vlgmr.msra.gmra.mxu1 %v1129_v7  ;;  %191 = vmatpush.msra.mxu2 %v1214_v6 }
   0xa   :  { %288 = vmatpush.msrb.mxu1 %v1186_v0  ;;  %390 = vmatpush.msrb.mxu0 %v1206_v5 }
   0xb   :  { %238 = vmatpush.msrb.mxu2 %v1186_v0  ;;  %582 = vmatpush.msra.mxu3 %v525_v34 }
   0xc   :  { %289 = vmatpush.msrb.mxu1 %v1194_v2  ;;  %391 = vmatpush.msrb.mxu0 %v1214_v6 }
   0xd   :  { %239 = vmatpush.msrb.mxu2 %v1194_v2  ;;  %1028 = vmatmul.msk.f32.gmra.mxu0 %vm56_vm0, %v46_v33 }
   0xe   :  { %290 = vmatpush.msrb.mxu1 %v1206_v5  ;;  %583 = vmatpush.msra.mxu3 %v524_v35  ;;  %v49_v35 = vld [vmem:[%s1546_s0 + $0x20] sm:$0xff] }
   0xf   :  { %240 = vmatpush.msrb.mxu2 %v1206_v5 }
  0x10   :  { %291 = vmatpush.msrb.mxu1 %v1214_v6 }
  0x11   :  { %241 = vmatpush.msrb.mxu2 %v1214_v6 }
  0x12   :  { %438 = vmatpush.msra.mxu1 %v1186_v0 }
  0x14   :  { %439 = vmatpush.msra.mxu1 %v1194_v2 }
  0x15   :  { %1029 = vmatmul.msk.f32.gmra.mxu0 %vm56_vm0, %v47_v55  ;;  %v52_v55 = vld [vmem:[%s1546_s0 + $0x38] sm:$0xff] }
  0x16   :  { %440 = vmatpush.msra.mxu1 %v1206_v5 }
  0x18   :  { %441 = vmatpush.msra.mxu1 %v1214_v6 }
  0x82   :  { %v98_v11 = vpop.f32.mrf.mxu0 }
  0x83   :  { %v99_v12 = vadd.f32 %v1241_v10, %v98_v11  ;;  %v48_v11 = vld [vmem:[%s1546_s0 + $0x18] sm:$0xff] }
  0x84   :  { %1030 = vmatmul.msk.f32.gmra.mxu0 %vm56_vm0, %v48_v11 }
  0x86   :  { %v143_v16 = vpop.f32.mrf.mxu1 }
  0x87   :  { %v146_v17 = vadd.f32 %v143_v16, %v99_v12 }
  0x89   :  { %v147_v18 = vmul.f32 %v146_v17, %v1250_v15 }
  0x8a   :  { %v101_v38 = vpop.f32.mrf.mxu0 }
  0x8b   :  { %1065 = vtanh.f32 %v147_v18  ;;  %v102_v39 = vadd.f32 %v1241_v10, %v101_v38 }
  0x8c   :  { %1031 = vmatmul.msk.f32.gmra.mxu0 %vm56_vm0, %v49_v35 }
  0x91   :  { %v1066_v19 = vpop.eup %1065 }
  0x92   :  { %v149_v20 = vmul.f32 0.5, %v1066_v19  ;;  %v104_v58 = vpop.f32.mrf.mxu0 }
  0x93   :  { %v105_v59 = vadd.f32 %v1241_v10, %v104_v58 }
  0x94   :  { %v150_v21 = vadd.f32 0.5, %v149_v20 }
  0x96   :  { %v151_v22 = vsel %vm1244_vm3, %v1066_v19, %v150_v21 }
  0x97   :  { %154 = vrot.lane.b32.xlu0 %v151_v22, %s1131_s3  ;;  %v152_v25 = vmul.f32 0.0, %v151_v22 }
 0x101   :  { %v107_v18 = vpop.f32.mrf.mxu0 }
 0x102   :  { %v108_v19 = vadd.f32 %v1241_v10, %v107_v18 }
 0x109   :  { %v155_v23 = vpop.permute.xlu0 %154  ;;  %v110_v38 = vpop.f32.mrf.mxu0 }
 0x10a   :  { %v157_v24 = vmul.f32 %v155_v23, %v151_v22 }
 0x10c   :  { %159 = vrot.lane.b32.xlu0 %v157_v24, %s1132_s23 }
 0x17e   :  { %v160_v26 = vpop.permute.xlu0 %159 }
 0x17f   :  { %v162_v27 = vadd.f32 %v160_v26, %v152_v25 }
 0x181   :  { %1067 = vtanh.f32 %v162_v27 }
 0x187   :  { %v1068_v28 = vpop.eup %1067 }
 0x188   :  { %165 = vrot.lane.b32.xlu1 %v1068_v28, %s1131_s3 }
 0x1fa   :  { %v166_v29 = vpop.permute.xlu1 %165 }
 0x1fb   :  { %v168_v30 = vmul.f32 %v166_v29, %v151_v22 }
 0x1fd   :  { %170 = vrot.lane.b32.xlu1 %v168_v30, %s1132_s23 }
 0x26f   :  { %v171_v36 = vpop.permute.xlu1 %170 }
 0x270   :  { %173 = vst.msk [vmem:[#allocation2] sm:$0xff] %vm122_vm4, %v171_v36  ;;  %1035 = vmatmul.msk.f32.vlgmr.msra.gmra.mxu2 %vm122_vm4, %v171_v36 }
 0x271   :  { %338 = vmatpush.msra.mxu2 %v1186_v0 }
 0x273   :  { %339 = vmatpush.msra.mxu2 %v1194_v2 }
 0x275   :  { %340 = vmatpush.msra.mxu2 %v1206_v5 }
 0x277   :  { %v533_v37 = vld [vmem:[#allocation2] sm:$0xff]  ;;  %341 = vmatpush.msra.mxu2 %v1214_v6 }
 0x278   :  { %1042 = vmatmul.msk.f32.vlgmr.msra.gmra.mxu3 %vm122_vm4, %v533_v37 }
 0x2f3   :  { %v193_v40 = vpop.f32.mrf.mxu2 }
 0x2f4   :  { %v196_v41 = vadd.f32 %v193_v40, %v102_v39  ;;  %v111_v39 = vadd.f32 %v1241_v10, %v110_v38 }
 0x2f6   :  { %v197_v42 = vmul.f32 %v196_v41, %v1250_v15 }
 0x2f8   :  { %1069 = vtanh.f32 %v197_v42 }
 0x2fe   :  { %v1070_v43 = vpop.eup %1069 }
 0x2ff   :  { %v199_v44 = vmul.f32 0.5, %v1070_v43 }
 0x301   :  { %v200_v45 = vadd.f32 0.5, %v199_v44 }
 0x303   :  { %v201_v46 = vsel %vm1244_vm3, %v1070_v43, %v200_v45 }
 0x304   :  { %204 = vrot.lane.b32.xlu2 %v201_v46, %s1131_s3  ;;  %v202_v49 = vmul.f32 %v201_v46, %v162_v27 }
 0x35e   :  { %v205_v47 = vpop.permute.xlu2 %204 }
 0x35f   :  { %v207_v48 = vmul.f32 %v205_v47, %v201_v46 }
 0x361   :  { %209 = vrot.lane.b32.xlu2 %v207_v48, %s1132_s23 }
 0x3bb   :  { %v210_v50 = vpop.permute.xlu2 %209 }
 0x3bc   :  { %v212_v51 = vadd.f32 %v210_v50, %v202_v49 }
 0x3be   :  { %1071 = vtanh.f32 %v212_v51 }
 0x3c4   :  { %v1072_v52 = vpop.eup %1071 }
 0x3c5   :  { %215 = vrot.lane.b32.xlu0 %v1072_v52, %s1131_s3 }
 0x437   :  { %v216_v53 = vpop.permute.xlu0 %215 }
 0x438   :  { %v218_v54 = vmul.f32 %v216_v53, %v201_v46  ;;  %v50_v53 = vld [vmem:[%s1546_s0 + $0x28] sm:$0xff] }
 0x439   :  { %1032 = vmatmul.msk.f32.gmra.mxu0 %vm56_vm0, %v50_v53 }
 0x43a   :  { %220 = vrot.lane.b32.xlu1 %v218_v54, %s1132_s23  ;;  %v51_v54 = vld [vmem:[%s1546_s0 + $0x30] sm:$0xff] }
 0x441   :  { %1033 = vmatmul.msk.f32.gmra.mxu0 %vm56_vm0, %v51_v54 }
 0x449   :  { %1034 = vmatmul.msk.f32.gmra.mxu0 %vm56_vm0, %v52_v55 }
 0x4ac   :  { %v221_v56 = vpop.permute.xlu1 %220 }
 0x4ad   :  { %223 = vst.msk [vmem:[#allocation2 + $0x8] sm:$0xff] %vm122_vm4, %v221_v56  ;;  %1036 = vmatmul.msk.f32.vlgmr.msrb.gmra.mxu2 %vm122_vm4, %v221_v56 }
 0x4ae   :  { %488 = vmatpush.msrb.mxu2 %v1186_v0 }
 0x4b0   :  { %489 = vmatpush.msrb.mxu2 %v1194_v2 }
 0x4b2   :  { %490 = vmatpush.msrb.mxu2 %v1206_v5 }
 0x4b4   :  { %v534_v57 = vld [vmem:[#allocation2 + $0x8] sm:$0xff]  ;;  %491 = vmatpush.msrb.mxu2 %v1214_v6 }
 0x4b5   :  { %1043 = vmatmul.msk.f32.gmra.mxu3 %vm122_vm4, %v534_v57 }
 0x530   :  { %v243_v60 = vpop.f32.mrf.mxu2 }
 0x531   :  { %v246_v61 = vadd.f32 %v243_v60, %v105_v59  ;;  %v113_v60 = vpop.f32.mrf.mxu0 }
 0x533   :  { %v247_v62 = vmul.f32 %v246_v61, %v1250_v15 }
 0x535   :  { %1073 = vtanh.f32 %v247_v62 }
 0x539   :  { %v116_v61 = vpop.f32.mrf.mxu0 }
 0x53b   :  { %v1074_v63 = vpop.eup %1073 }
 0x53c   :  { %v249_v1 = vmul.f32 0.5, %v1074_v63 }
 0x53e   :  { %v250_v0 = vadd.f32 0.5, %v249_v1 }
 0x540   :  { %v251_v2 = vsel %vm1244_vm3, %v1074_v63, %v250_v0  ;;  %v114_v63 = vadd.f32 %v1241_v10, %v113_v60 }
 0x541   :  { %254 = vrot.lane.b32.xlu2 %v251_v2, %s1131_s3  ;;  %v252_v5 = vmul.f32 %v251_v2, %v212_v51  ;;  %v1354_v62 = vpop.f32.mrf.mxu0 }
 0x59b   :  { %v255_v3 = vpop.permute.xlu2 %254 }
 0x59c   :  { %v257_v4 = vmul.f32 %v255_v3, %v251_v2 }
 0x59e   :  { %259 = vrot.lane.b32.xlu0 %v257_v4, %s1132_s23 }
 0x610   :  { %v260_v6 = vpop.permute.xlu0 %259 }
 0x611   :  { %v262_v8 = vadd.f32 %v260_v6, %v252_v5 }
 0x613   :  { %1075 = vtanh.f32 %v262_v8 }
 0x619   :  { %v1076_v9 = vpop.eup %1075 }
 0x61a   :  { %265 = vrot.lane.b32.xlu1 %v1076_v9, %s1131_s3 }
 0x68c   :  { %v266_v12 = vpop.permute.xlu1 %265 }
 0x68d   :  { %v268_v14 = vmul.f32 %v266_v12, %v251_v2 }
 0x68f   :  { %270 = vrot.lane.b32.xlu2 %v268_v14, %s1132_s23 }
 0x6e9   :  { %v271_v16 = vpop.permute.xlu2 %270 }
 0x6ea   :  { %273 = vst.msk [vmem:[#allocation2 + $0x10] sm:$0xff] %vm122_vm4, %v271_v16  ;;  %1037 = vmatmul.msk.f32.vlgmr.msrb.gmra.mxu1 %vm122_vm4, %v271_v16 }
 0x6f1   :  { %v535_v17 = vld [vmem:[#allocation2 + $0x10] sm:$0xff] }
 0x6f2   :  { %1044 = vmatmul.msk.f32.gmra.mxu3 %vm122_vm4, %v535_v17 }
 0x767   :  { %v293_v20 = vpop.f32.mrf.mxu1 }
 0x768   :  { %v296_v21 = vadd.f32 %v293_v20, %v108_v19  ;;  %v1367_v19 = vld [vmem:[%s1550_s5 + $0x18] sm:$0xff]  ;;  %v1372_v20 = vld [vmem:[%s1550_s5 + $0x10] sm:$0xff] }
 0x769   :  { %621 = vmatpush.msrb.mxu1 %v1367_v19 }
 0x76a   :  { %v297_v22 = vmul.f32 %v296_v21, %v1250_v15  ;;  %v1379_v21 = vld [vmem:[%s1550_s5 + $0x8] sm:$0xff] }
 0x76b   :  { %622 = vmatpush.msrb.mxu1 %v1372_v20 }
 0x76c   :  { %1077 = vtanh.f32 %v297_v22  ;;  %v1386_v22 = vld [vmem:[%s1550_s5] sm:$0xff] }
 0x76d   :  { %623 = vmatpush.msrb.mxu1 %v1379_v21 }
 0x76f   :  { %624 = vmatpush.msrb.mxu1 %v1386_v22 }
 0x772   :  { %v1078_v23 = vpop.eup %1077 }
 0x773   :  { %v299_v24 = vmul.f32 0.5, %v1078_v23 }
 0x775   :  { %v300_v25 = vadd.f32 0.5, %v299_v24 }
 0x777   :  { %v301_v26 = vsel %vm1244_vm3, %v1078_v23, %v300_v25  ;;  %v117_v25 = vadd.f32 %v1241_v10, %v116_v61 }
 0x778   :  { %304 = vrot.lane.b32.xlu0 %v301_v26, %s1131_s3  ;;  %v302_v29 = vmul.f32 %v301_v26, %v262_v8 }
 0x7ea   :  { %v305_v27 = vpop.permute.xlu0 %304 }
 0x7eb   :  { %v307_v28 = vmul.f32 %v305_v27, %v301_v26 }
 0x7ed   :  { %309 = vrot.lane.b32.xlu1 %v307_v28, %s1132_s23  ;;  %v1408_v28 = vld [vmem:[%s1549_s6] ss:$0 sm:$0xff] }
 0x85f   :  { %v310_v30 = vpop.permute.xlu1 %309 }
 0x860   :  { %v312_v31 = vadd.f32 %v310_v30, %v302_v29 }
 0x862   :  { %1079 = vtanh.f32 %v312_v31 }
 0x868   :  { %v1080_v32 = vpop.eup %1079 }
 0x869   :  { %315 = vrot.lane.b32.xlu2 %v1080_v32, %s1131_s3 }
 0x8c3   :  { %v316_v33 = vpop.permute.xlu2 %315 }
 0x8c4   :  { %v318_v34 = vmul.f32 %v316_v33, %v301_v26 }
 0x8c6   :  { %320 = vrot.lane.b32.xlu0 %v318_v34, %s1132_s23 }
 0x938   :  { %v321_v36 = vpop.permute.xlu0 %320 }
 0x939   :  { %323 = vst.msk [vmem:[#allocation2 + $0x18] sm:$0xff] %vm122_vm4, %v321_v36  ;;  %1038 = vmatmul.msk.f32.vlgmr.msra.gmra.mxu2 %vm122_vm4, %v321_v36 }
 0x93a   :  { %669 = vmatpush.msra.mxu2 %v1367_v19 }
 0x93c   :  { %670 = vmatpush.msra.mxu2 %v1372_v20 }
 0x93e   :  { %671 = vmatpush.msra.mxu2 %v1379_v21 }
 0x940   :  { %v536_v37 = vld [vmem:[#allocation2 + $0x18] sm:$0xff]  ;;  %672 = vmatpush.msra.mxu2 %v1386_v22 }
 0x941   :  { %1045 = vmatmul.msk.f32.gmra.mxu3 %vm122_vm4, %v536_v37 }
 0x9bc   :  { %v343_v40 = vpop.f32.mrf.mxu2 }
 0x9bd   :  { %v346_v41 = vadd.f32 %v343_v40, %v111_v39 }
 0x9bf   :  { %v347_v42 = vmul.f32 %v346_v41, %v1250_v15 }
 0x9c1   :  { %1081 = vtanh.f32 %v347_v42 }
 0x9c7   :  { %v1082_v43 = vpop.eup %1081 }
 0x9c8   :  { %v349_v44 = vmul.f32 0.5, %v1082_v43 }
 0x9ca   :  { %v350_v45 = vadd.f32 0.5, %v349_v44 }
 0x9cc   :  { %v351_v46 = vsel %vm1244_vm3, %v1082_v43, %v350_v45 }
 0x9cd   :  { %354 = vrot.lane.b32.xlu1 %v351_v46, %s1131_s3  ;;  %v352_v49 = vmul.f32 %v351_v46, %v312_v31 }
 0xa3f   :  { %v355_v47 = vpop.permute.xlu1 %354 }
 0xa40   :  { %v357_v48 = vmul.f32 %v355_v47, %v351_v46 }
 0xa42   :  { %359 = vrot.lane.b32.xlu2 %v357_v48, %s1132_s23 }
 0xa9c   :  { %v360_v50 = vpop.permute.xlu2 %359 }
 0xa9d   :  { %v362_v51 = vadd.f32 %v360_v50, %v352_v49 }
 0xa9f   :  { %1083 = vtanh.f32 %v362_v51 }
 0xaa5   :  { %v1084_v52 = vpop.eup %1083 }
 0xaa6   :  { %365 = vrot.lane.b32.xlu0 %v1084_v52, %s1131_s3 }
 0xb18   :  { %v366_v56 = vpop.permute.xlu0 %365 }
 0xb19   :  { %v368_v57 = vmul.f32 %v366_v56, %v351_v46 }
 0xb1b   :  { %370 = vrot.lane.b32.xlu1 %v368_v57, %s1132_s23 }
 0xb8d   :  { %v371_v58 = vpop.permute.xlu1 %370 }
 0xb8e   :  { %373 = vst.msk [vmem:[#allocation2 + $0x20] sm:$0xff] %vm122_vm4, %v371_v58  ;;  %1039 = vmatmul.msk.f32.vlgmr.msrb.gmra.mxu0 %vm122_vm4, %v371_v58 }
 0xb95   :  { %v537_v59 = vld [vmem:[#allocation2 + $0x20] sm:$0xff] }
 0xb96   :  { %1046 = vmatmul.msk.f32.gmra.mxu3 %vm122_vm4, %v537_v59 }
 0xc0b   :  { %v393_v1 = vpop.f32.mrf.mxu0 }
 0xc0c   :  { %v396_v0 = vadd.f32 %v393_v1, %v114_v63 }
 0xc0e   :  { %v397_v2 = vmul.f32 %v396_v0, %v1250_v15 }
 0xc10   :  { %1085 = vtanh.f32 %v397_v2 }
 0xc16   :  { %v1086_v3 = vpop.eup %1085 }
 0xc17   :  { %v399_v4 = vmul.f32 0.5, %v1086_v3 }
 0xc19   :  { %v400_v5 = vadd.f32 0.5, %v399_v4 }
 0xc1b   :  { %v401_v6 = vsel %vm1244_vm3, %v1086_v3, %v400_v5 }
 0xc1c   :  { %404 = vrot.lane.b32.xlu2 %v401_v6, %s1131_s3  ;;  %v402_v11 = vmul.f32 %v401_v6, %v362_v51 }
 0xc76   :  { %v405_v8 = vpop.permute.xlu2 %404 }
 0xc77   :  { %v407_v9 = vmul.f32 %v405_v8, %v401_v6 }
 0xc79   :  { %409 = vrot.lane.b32.xlu0 %v407_v9, %s1132_s23 }
 0xceb   :  { %v410_v12 = vpop.permute.xlu0 %409 }
 0xcec   :  { %v412_v14 = vadd.f32 %v410_v12, %v402_v11 }
 0xcee   :  { %1087 = vtanh.f32 %v412_v14 }
 0xcf4   :  { %v1088_v16 = vpop.eup %1087 }
 0xcf5   :  { %415 = vrot.lane.b32.xlu1 %v1088_v16, %s1131_s3 }
 0xd67   :  { %v416_v17 = vpop.permute.xlu1 %415 }
 0xd68   :  { %v418_v18 = vmul.f32 %v416_v17, %v401_v6 }
 0xd6a   :  { %420 = vrot.lane.b32.xlu2 %v418_v18, %s1132_s23 }
 0xdc4   :  { %v421_v23 = vpop.permute.xlu2 %420 }
 0xdc5   :  { %423 = vst.msk [vmem:[#allocation2 + $0x28] sm:$0xff] %vm122_vm4, %v421_v23  ;;  %1040 = vmatmul.msk.f32.vlgmr.msra.gmra.mxu1 %vm122_vm4, %v421_v23 }
 0xdc6   :  { %717 = vmatpush.msra.mxu1 %v1367_v19 }
 0xdc8   :  { %718 = vmatpush.msra.mxu1 %v1372_v20 }
 0xdca   :  { %719 = vmatpush.msra.mxu1 %v1379_v21 }
 0xdcc   :  { %v538_v24 = vld [vmem:[#allocation2 + $0x28] sm:$0xff]  ;;  %720 = vmatpush.msra.mxu1 %v1386_v22 }
 0xdcd   :  { %1047 = vmatmul.msk.f32.gmra.mxu3 %vm122_vm4, %v538_v24  ;;  %625 = vmatmul.f32.vlgmr.msrb.gmra.mxu1 %v1129_v7  ;;  %v585_v7 = vpop.f32.mrf.mxu3 }
 0xdce   :  { %813 = vmatpush.msrb.mxu1 %v1367_v19  ;;  %v586_v30 = vadd.f32 %v1408_v28, %v585_v7 }
 0xdd0   :  { %814 = vmatpush.msrb.mxu1 %v1372_v20 }
 0xdd2   :  { %815 = vmatpush.msrb.mxu1 %v1379_v21 }
 0xdd4   :  { %816 = vmatpush.msrb.mxu1 %v1386_v22 }
 0xdd5   :  { %v588_v63 = vpop.f32.mrf.mxu3 }
 0xdd6   :  { %v589_v1 = vadd.f32 %v1408_v28, %v588_v63 }
 0xe42   :  { %v443_v26 = vpop.f32.mrf.mxu1 }
 0xe43   :  { %v446_v27 = vadd.f32 %v443_v26, %v117_v25  ;;  %v591_v25 = vpop.f32.mrf.mxu3 }
 0xe44   :  { %v592_v26 = vadd.f32 %v1408_v28, %v591_v25 }
 0xe45   :  { %v447_v29 = vmul.f32 %v446_v27, %v1250_v15 }
 0xe47   :  { %1089 = vtanh.f32 %v447_v29 }
 0xe4a   :  { %v626_v31 = vpop.f32.mrf.mxu1 }
 0xe4b   :  { %v629_v32 = vadd.f32 %v626_v31, %v586_v30 }
 0xe4d   :  { %v1090_v33 = vpop.eup %1089  ;;  %v630_v34 = vmul.f32 %v629_v32, %v1250_v15 }
 0xe4e   :  { %v449_v35 = vmul.f32 0.5, %v1090_v33 }
 0xe4f   :  { %1091 = vtanh.f32 %v630_v34 }
 0xe50   :  { %v450_v36 = vadd.f32 0.5, %v449_v35 }
 0xe52   :  { %v451_v37 = vsel %vm1244_vm3, %v1090_v33, %v450_v36 }
 0xe53   :  { %454 = vrot.lane.b32.xlu0 %v451_v37, %s1131_s3  ;;  %v452_v46 = vmul.f32 %v451_v37, %v412_v14 }
 0xe55   :  { %v1092_v38 = vpop.eup %1091 }
 0xe56   :  { %v632_v39 = vmul.f32 0.5, %v1092_v38 }
 0xe58   :  { %v633_v40 = vadd.f32 0.5, %v632_v39 }
 0xe5a   :  { %v634_v41 = vsel %vm1244_vm3, %v1092_v38, %v633_v40 }
 0xe5b   :  { %637 = vrot.lane.b32.xlu1 %v634_v41, %s1131_s3  ;;  %v635_v50 = vmul.f32 0.0, %v634_v41 }
 0xec5   :  { %v455_v42 = vpop.permute.xlu0 %454 }
 0xec6   :  { %v457_v43 = vmul.f32 %v455_v42, %v451_v37 }
 0xec8   :  { %459 = vrot.lane.b32.xlu2 %v457_v43, %s1132_s23  ;;  %v594_v43 = vpop.f32.mrf.mxu3 }
 0xecd   :  { %v638_v44 = vpop.permute.xlu1 %637 }
 0xece   :  { %v640_v45 = vmul.f32 %v638_v44, %v634_v41  ;;  %v595_v44 = vadd.f32 %v1408_v28, %v594_v43 }
 0xed0   :  { %642 = vrot.lane.b32.xlu0 %v640_v45, %s1132_s23 }
 0xf22   :  { %v460_v47 = vpop.permute.xlu2 %459 }
 0xf23   :  { %v1421_v48 = vadd.f32 %v460_v47, %v452_v46 }
 0xf25   :  { %1093 = vtanh.f32 %v1421_v48 }
 0xf2b   :  { %v1094_v49 = vpop.eup %1093 }
 0xf2c   :  { %465 = vrot.lane.b32.xlu1 %v1094_v49, %s1131_s3 }
 0xf42   :  { %v643_v51 = vpop.permute.xlu0 %642 }
 0xf43   :  { %v645_v52 = vadd.f32 %v643_v51, %v635_v50 }
 0xf45   :  { %1095 = vtanh.f32 %v645_v52 }
 0xf4b   :  { %v1096_v53 = vpop.eup %1095 }
 0xf4c   :  { %648 = vrot.lane.b32.xlu2 %v1096_v53, %s1131_s3 }
 0xf9e   :  { %v466_v54 = vpop.permute.xlu1 %465 }
 0xf9f   :  { %v468_v55 = vmul.f32 %v466_v54, %v451_v37 }
 0xfa1   :  { %470 = vrot.lane.b32.xlu0 %v468_v55, %s1132_s23 }
 0xfa6   :  { %v649_v56 = vpop.permute.xlu2 %648 }
 0xfa7   :  { %v651_v57 = vmul.f32 %v649_v56, %v634_v41 }
 0xfa9   :  { %653 = vrot.lane.b32.xlu1 %v651_v57, %s1132_s23 }
0x1013   :  { %v471_v58 = vpop.permute.xlu0 %470 }
0x1014   :  { %473 = vst.msk [vmem:[#allocation2 + $0x30] sm:$0xff] %vm122_vm4, %v471_v58  ;;  %1041 = vmatmul.msk.f32.vlgmr.msrb.gmra.mxu2 %vm122_vm4, %v471_v58  ;;  %v597_v58 = vpop.f32.mrf.mxu3 }
0x1015   :  { %765 = vmatpush.msrb.mxu2 %v1367_v19 }
0x1017   :  { %766 = vmatpush.msrb.mxu2 %v1372_v20 }
0x1019   :  { %767 = vmatpush.msrb.mxu2 %v1379_v21 }
0x101b   :  { %v654_v59 = vpop.permute.xlu1 %653  ;;  %v539_v60 = vld [vmem:[#allocation2 + $0x30] sm:$0xff]  ;;  %768 = vmatpush.msrb.mxu2 %v1386_v22 }
0x101c   :  { %1048 = vmatmul.msk.f32.gmra.mxu3 %vm122_vm4, %v539_v60  ;;  %1050 = vmatmul.msk.f32.vlgmr.msra.gmra.mxu2 %vm122_vm4, %v654_v59  ;;  %v598_v59 = vadd.f32 %v1408_v28, %v597_v58 }
0x101d   :  { %861 = vmatpush.msra.mxu2 %v1367_v19 }
0x101f   :  { %862 = vmatpush.msra.mxu2 %v1372_v20 }
0x1021   :  { %863 = vmatpush.msra.mxu2 %v1379_v21 }
0x1023   :  { %864 = vmatpush.msra.mxu2 %v1386_v22 }
0x1097   :  { %v1440_v61 = vpop.f32.mrf.mxu2 }
0x109f   :  { %v674_v0 = vpop.f32.mrf.mxu2 }
0x10a0   :  { %v677_v2 = vadd.f32 %v674_v0, %v589_v1 }
0x10a2   :  { %v678_v3 = vmul.f32 %v677_v2, %v1250_v15 }
0x10a4   :  { %1097 = vtanh.f32 %v678_v3 }
0x10aa   :  { %v1098_v4 = vpop.eup %1097 }
0x10ab   :  { %v680_v5 = vmul.f32 0.5, %v1098_v4 }
0x10ad   :  { %v681_v6 = vadd.f32 0.5, %v680_v5 }
0x10af   :  { %v682_v8 = vsel %vm1244_vm3, %v1098_v4, %v681_v6 }
0x10b0   :  { %685 = vrot.lane.b32.xlu2 %v682_v8, %s1131_s3  ;;  %v683_v12 = vmul.f32 %v682_v8, %v645_v52 }
0x110a   :  { %v686_v9 = vpop.permute.xlu2 %685 }
0x110b   :  { %v688_v11 = vmul.f32 %v686_v9, %v682_v8 }
0x110d   :  { %690 = vrot.lane.b32.xlu0 %v688_v11, %s1132_s23 }
0x117f   :  { %v691_v14 = vpop.permute.xlu0 %690 }
0x1180   :  { %v693_v16 = vadd.f32 %v691_v14, %v683_v12 }
0x1182   :  { %1099 = vtanh.f32 %v693_v16 }
0x1188   :  { %v1100_v17 = vpop.eup %1099 }
0x1189   :  { %696 = vrot.lane.b32.xlu1 %v1100_v17, %s1131_s3 }
0x11fb   :  { %v697_v18 = vpop.permute.xlu1 %696 }
0x11fc   :  { %v699_v23 = vmul.f32 %v697_v18, %v682_v8  ;;  %v600_v18 = vpop.f32.mrf.mxu3 }
0x11fe   :  { %701 = vrot.lane.b32.xlu2 %v699_v23, %s1132_s23  ;;  %v601_v23 = vadd.f32 %v1408_v28, %v600_v18 }
0x1258   :  { %v702_v24 = vpop.permute.xlu2 %701 }
0x1259   :  { %1051 = vmatmul.msk.f32.vlgmr.msra.gmra.mxu1 %vm122_vm4, %v702_v24 }
0x125a   :  { %909 = vmatpush.msra.mxu1 %v1367_v19 }
0x125c   :  { %910 = vmatpush.msra.mxu1 %v1372_v20 }
0x125e   :  { %911 = vmatpush.msra.mxu1 %v1379_v21 }
0x1260   :  { %912 = vmatpush.msra.mxu1 %v1386_v22 }
0x12d6   :  { %v722_v27 = vpop.f32.mrf.mxu1 }
0x12d7   :  { %v725_v29 = vadd.f32 %v722_v27, %v592_v26 }
0x12d9   :  { %v726_v7 = vmul.f32 %v725_v29, %v1250_v15 }
0x12db   :  { %1101 = vtanh.f32 %v726_v7 }
0x12e1   :  { %v1102_v30 = vpop.eup %1101 }
0x12e2   :  { %v728_v31 = vmul.f32 0.5, %v1102_v30 }
0x12e4   :  { %v729_v32 = vadd.f32 0.5, %v728_v31  ;;  %v120_v31 = vadd.f32 %v1241_v10, %v1354_v62 }
0x12e6   :  { %v730_v33 = vsel %vm1244_vm3, %v1102_v30, %v729_v32  ;;  %v496_v32 = vadd.f32 %v1440_v61, %v120_v31 }
0x12e7   :  { %733 = vrot.lane.b32.xlu0 %v730_v33, %s1131_s3  ;;  %v731_v36 = vmul.f32 %v730_v33, %v693_v16 }
0x1359   :  { %v734_v34 = vpop.permute.xlu0 %733 }
0x135a   :  { %v736_v35 = vmul.f32 %v734_v34, %v730_v33 }
0x135c   :  { %738 = vrot.lane.b32.xlu1 %v736_v35, %s1132_s23 }
0x13ce   :  { %v739_v37 = vpop.permute.xlu1 %738 }
0x13cf   :  { %v741_v38 = vadd.f32 %v739_v37, %v731_v36 }
0x13d1   :  { %1103 = vtanh.f32 %v741_v38 }
0x13d7   :  { %v1104_v39 = vpop.eup %1103 }
0x13d8   :  { %744 = vrot.lane.b32.xlu2 %v1104_v39, %s1131_s3 }
0x1432   :  { %v745_v40 = vpop.permute.xlu2 %744 }
0x1433   :  { %v747_v41 = vmul.f32 %v745_v40, %v730_v33  ;;  %v497_v33 = vmul.f32 %v496_v32, %v1250_v15 }
0x1435   :  { %749 = vrot.lane.b32.xlu0 %v747_v41, %s1132_s23 }
0x14a7   :  { %v750_v42 = vpop.permute.xlu0 %749 }
0x14a8   :  { %1052 = vmatmul.msk.f32.vlgmr.msrb.gmra.mxu2 %vm122_vm4, %v750_v42 }
0x14a9   :  { %957 = vmatpush.msrb.mxu2 %v1367_v19 }
0x14ab   :  { %958 = vmatpush.msrb.mxu2 %v1372_v20 }
0x14ad   :  { %959 = vmatpush.msrb.mxu2 %v1379_v21 }
0x14af   :  { %960 = vmatpush.msrb.mxu2 %v1386_v22 }
0x152b   :  { %v770_v45 = vpop.f32.mrf.mxu2 }
0x152c   :  { %v773_v46 = vadd.f32 %v770_v45, %v595_v44 }
0x152e   :  { %v774_v47 = vmul.f32 %v773_v46, %v1250_v15  ;;  %v603_v46 = vpop.f32.mrf.mxu3 }
0x1530   :  { %1105 = vtanh.f32 %v774_v47  ;;  %v604_v47 = vadd.f32 %v1408_v28, %v603_v46 }
0x1536   :  { %v1106_v49 = vpop.eup %1105 }
0x1537   :  { %v776_v50 = vmul.f32 0.5, %v1106_v49 }
0x1539   :  { %v777_v51 = vadd.f32 0.5, %v776_v50 }
0x153b   :  { %v778_v19 = vsel %vm1244_vm3, %v1106_v49, %v777_v51 }
0x153c   :  { %781 = vrot.lane.b32.xlu1 %v778_v19, %s1131_s3  ;;  %v779_v22 = vmul.f32 %v778_v19, %v741_v38 }
0x15ae   :  { %v782_v20 = vpop.permute.xlu1 %781 }
0x15af   :  { %v784_v21 = vmul.f32 %v782_v20, %v778_v19 }
0x15b1   :  { %786 = vrot.lane.b32.xlu2 %v784_v21, %s1132_s23 }
0x160b   :  { %v787_v52 = vpop.permute.xlu2 %786 }
0x160c   :  { %v789_v53 = vadd.f32 %v787_v52, %v779_v22 }
0x160e   :  { %1107 = vtanh.f32 %v789_v53 }
0x1614   :  { %v1108_v54 = vpop.eup %1107 }
0x1615   :  { %792 = vrot.lane.b32.xlu0 %v1108_v54, %s1131_s3 }
0x1687   :  { %v793_v55 = vpop.permute.xlu0 %792 }
0x1688   :  { %v795_v56 = vmul.f32 %v793_v55, %v778_v19 }
0x168a   :  { %797 = vrot.lane.b32.xlu1 %v795_v56, %s1132_s23 }
0x16fc   :  { %v798_v57 = vpop.permute.xlu1 %797 }
0x16fd   :  { %1053 = vmatmul.msk.f32.vlgmr.msrb.gmra.mxu1 %vm122_vm4, %v798_v57 }
0x177a   :  { %v818_v60 = vpop.f32.mrf.mxu1 }
0x177b   :  { %v821_v63 = vadd.f32 %v818_v60, %v598_v59 }
0x177d   :  { %v822_v1 = vmul.f32 %v821_v63, %v1250_v15 }
0x177f   :  { %1109 = vtanh.f32 %v822_v1 }
0x1785   :  { %v1110_v0 = vpop.eup %1109 }
0x1786   :  { %v824_v2 = vmul.f32 0.5, %v1110_v0 }
0x1788   :  { %v825_v3 = vadd.f32 0.5, %v824_v2 }
0x178a   :  { %v826_v4 = vsel %vm1244_vm3, %v1110_v0, %v825_v3 }
0x178b   :  { %829 = vrot.lane.b32.xlu2 %v826_v4, %s1131_s3  ;;  %v827_v8 = vmul.f32 %v826_v4, %v789_v53 }
0x17e5   :  { %v830_v5 = vpop.permute.xlu2 %829 }
0x17e6   :  { %v832_v6 = vmul.f32 %v830_v5, %v826_v4 }
0x17e8   :  { %834 = vrot.lane.b32.xlu0 %v832_v6, %s1132_s23 }
0x185a   :  { %v835_v9 = vpop.permute.xlu0 %834 }
0x185b   :  { %v837_v11 = vadd.f32 %v835_v9, %v827_v8 }
0x185d   :  { %1111 = vtanh.f32 %v837_v11 }
0x1863   :  { %v1112_v12 = vpop.eup %1111 }
0x1864   :  { %840 = vrot.lane.b32.xlu1 %v1112_v12, %s1131_s3 }
0x18d6   :  { %v841_v14 = vpop.permute.xlu1 %840 }
0x18d7   :  { %v843_v16 = vmul.f32 %v841_v14, %v826_v4 }
0x18d9   :  { %845 = vrot.lane.b32.xlu2 %v843_v16, %s1132_s23 }
0x1933   :  { %v846_v17 = vpop.permute.xlu2 %845 }
0x1934   :  { %1054 = vmatmul.msk.f32.vlgmr.msra.gmra.mxu2 %vm122_vm4, %v846_v17 }
0x19b7   :  { %v866_v24 = vpop.f32.mrf.mxu2 }
0x19b8   :  { %v869_v25 = vadd.f32 %v866_v24, %v601_v23 }
0x19ba   :  { %v870_v26 = vmul.f32 %v869_v25, %v1250_v15 }
0x19bc   :  { %1113 = vtanh.f32 %v870_v26 }
0x19bd   :  { %1115 = vtanh.f32 %v497_v33  ;;  %v1064_v33 = vld [vmem:[%s1552_s8] ss:$0 sm:$0xff] }
0x19c2   :  { %v1114_v27 = vpop.eup %1113 }
0x19c3   :  { %v872_v29 = vmul.f32 0.5, %v1114_v27  ;;  %v1116_v34 = vpop.eup %1115 }
0x19c4   :  { %v499_v37 = vmul.f32 0.5, %v1116_v34 }
0x19c5   :  { %v873_v7 = vadd.f32 0.5, %v872_v29  ;;  %v989_v29 = vld [vmem:[%s1551_s7 + $0x8] sm:$0xff] }
0x19c6   :  { %v500_v38 = vadd.f32 0.5, %v499_v37 }
0x19c7   :  { %v874_v30 = vsel %vm1244_vm3, %v1114_v27, %v873_v7  ;;  %v988_v7 = vld [vmem:[%s1551_s7] sm:$0xff] }
0x19c8   :  { %877 = vrot.lane.b32.xlu0 %v874_v30, %s1131_s3  ;;  %v501_v39 = vsel %vm1244_vm3, %v1116_v34, %v500_v38  ;;  %v875_v40 = vmul.f32 %v874_v30, %v837_v11 }
0x19c9   :  { %v502_v21 = vmul.f32 %v501_v39, %v1421_v48 }
0x1a3a   :  { %v878_v35 = vpop.permute.xlu0 %877 }
0x1a3b   :  { %v880_v36 = vmul.f32 %v878_v35, %v874_v30 }
0x1a3d   :  { %882 = vrot.lane.b32.xlu1 %v880_v36, %s1132_s23 }
0x1a45   :  { %504 = vrot.lane.b32.xlu1 %v501_v39, %s1131_s3 }
0x1aaf   :  { %v883_v41 = vpop.permute.xlu1 %882 }
0x1ab0   :  { %v885_v10 = vadd.f32 %v883_v41, %v875_v40 }
0x1ab2   :  { %1117 = vtanh.f32 %v885_v10 }
0x1ab7   :  { %v505_v43 = vpop.permute.xlu1 %504 }
0x1ab8   :  { %v1118_v62 = vpop.eup %1117  ;;  %v507_v44 = vmul.f32 %v505_v43, %v501_v39 }
0x1ab9   :  { %888 = vrot.lane.b32.xlu2 %v1118_v62, %s1131_s3 }
0x1b13   :  { %v889_v61 = vpop.permute.xlu2 %888 }
0x1b14   :  { %v891_v42 = vmul.f32 %v889_v61, %v874_v30 }
0x1b16   :  { %893 = vrot.lane.b32.xlu0 %v891_v42, %s1132_s23 }
0x1b1e   :  { %509 = vrot.lane.b32.xlu0 %v507_v44, %s1132_s23 }
0x1b88   :  { %v894_v45 = vpop.permute.xlu0 %893 }
0x1b89   :  { %1055 = vmatmul.msk.f32.vlgmr.msra.gmra.mxu1 %vm122_vm4, %v894_v45 }
0x1b90   :  { %v510_v20 = vpop.permute.xlu0 %509 }
0x1b91   :  { %v512_v52 = vadd.f32 %v510_v20, %v502_v21 }
0x1c06   :  { %v914_v49 = vpop.f32.mrf.mxu1 }
0x1c07   :  { %v917_v50 = vadd.f32 %v914_v49, %v604_v47 }
0x1c09   :  { %v918_v51 = vmul.f32 %v917_v50, %v1250_v15 }
0x1c0b   :  { %1119 = vtanh.f32 %v918_v51 }
0x1c0c   :  { %1121 = vtanh.f32 %v512_v52 }
0x1c11   :  { %v1120_v19 = vpop.eup %1119 }
0x1c12   :  { %v920_v22 = vmul.f32 0.5, %v1120_v19  ;;  %v1122_v55 = vpop.eup %1121 }
0x1c14   :  { %v921_v53 = vadd.f32 0.5, %v920_v22 }
0x1c16   :  { %v922_v54 = vsel %vm1244_vm3, %v1120_v19, %v921_v53 }
0x1c17   :  { %925 = vrot.lane.b32.xlu2 %v922_v54, %s1131_s3  ;;  %v923_v48 = vmul.f32 %v922_v54, %v885_v10 }
0x1c1f   :  { %515 = vrot.lane.b32.xlu2 %v1122_v55, %s1131_s3 }
0x1c71   :  { %v926_v56 = vpop.permute.xlu2 %925 }
0x1c72   :  { %v928_v57 = vmul.f32 %v926_v56, %v922_v54 }
0x1c74   :  { %930 = vrot.lane.b32.xlu1 %v928_v57, %s1132_s23 }
0x1c79   :  { %v516_v58 = vpop.permute.xlu2 %515 }
0x1c7a   :  { %v518_v59 = vmul.f32 %v516_v58, %v501_v39 }
0x1c7c   :  { %520 = vrot.lane.b32.xlu1 %v518_v59, %s1132_s23 }
0x1ce6   :  { %v931_v60 = vpop.permute.xlu1 %930 }
0x1ce7   :  { %v933_v63 = vadd.f32 %v931_v60, %v923_v48 }
0x1ce9   :  { %1123 = vtanh.f32 %v933_v63 }
0x1cee   :  { %v521_v1 = vpop.permute.xlu1 %520 }
0x1cef   :  { %v1124_v0 = vpop.eup %1123  ;;  %523 = vst.msk [vmem:[#allocation2 + $0x38] sm:$0xff] %vm122_vm4, %v521_v1 }
0x1cf0   :  { %936 = vrot.lane.b32.xlu0 %v1124_v0, %s1131_s3 }
0x1cf6   :  { %v540_v2 = vld [vmem:[#allocation2 + $0x38] sm:$0xff] }
0x1cf7   :  { %1049 = vmatmul.msk.f32.gmra.mxu3 %vm122_vm4, %v540_v2 }
0x1d62   :  { %v937_v3 = vpop.permute.xlu0 %936 }
0x1d63   :  { %v939_v4 = vmul.f32 %v937_v3, %v922_v54 }
0x1d65   :  { %941 = vrot.lane.b32.xlu2 %v939_v4, %s1132_s23 }
0x1d7a   :  { %v606_v6 = vpop.f32.mrf.mxu3 }
0x1d7b   :  { %v607_v8 = vadd.f32 %v1408_v28, %v606_v6 }
0x1dbf   :  { %v942_v5 = vpop.permute.xlu2 %941 }
0x1dc0   :  { %1056 = vmatmul.msk.f32.vlgmr.msrb.gmra.mxu2 %vm122_vm4, %v942_v5 }
0x1e43   :  { %v962_v9 = vpop.f32.mrf.mxu2 }
0x1e44   :  { %v965_v11 = vadd.f32 %v962_v9, %v607_v8 }
0x1e46   :  { %v966_v12 = vmul.f32 %v965_v11, %v1250_v15  ;;  %v991_v15 = vld [vmem:[%s1551_s7 + $0x18] sm:$0xff] }
0x1e47   :  { %1013 = vmatpush.msrb.mxu1 %v991_v15 }
0x1e48   :  { %1125 = vtanh.f32 %v966_v12 }
0x1e49   :  { %1014 = vmatpush.msrb.mxu1 %v990_v13 }
0x1e4b   :  { %1015 = vmatpush.msrb.mxu1 %v989_v29 }
0x1e4d   :  { %1016 = vmatpush.msrb.mxu1 %v988_v7 }
0x1e4e   :  { %v1126_v14 = vpop.eup %1125 }
0x1e4f   :  { %v968_v16 = vmul.f32 0.5, %v1126_v14 }
0x1e51   :  { %v969_v17 = vadd.f32 0.5, %v968_v16 }
0x1e53   :  { %v970_v18 = vsel %vm1244_vm3, %v1126_v14, %v969_v17 }
0x1e54   :  { %973 = vrot.lane.b32.xlu0 %v970_v18, %s1131_s3  ;;  %v971_v25 = vmul.f32 %v970_v18, %v933_v63 }
0x1ec6   :  { %v974_v23 = vpop.permute.xlu0 %973 }
0x1ec7   :  { %v976_v24 = vmul.f32 %v974_v23, %v970_v18 }
0x1ec9   :  { %978 = vrot.lane.b32.xlu1 %v976_v24, %s1132_s23 }
0x1f3b   :  { %v979_v26 = vpop.permute.xlu1 %978 }
0x1f3c   :  { %v981_v28 = vadd.f32 %v979_v26, %v971_v25 }
0x1f3e   :  { %1127 = vtanh.f32 %v981_v28 }
0x1f44   :  { %v1128_v27 = vpop.eup %1127 }
0x1f45   :  { %984 = vrot.lane.b32.xlu2 %v1128_v27, %s1131_s3 }
0x1f9f   :  { %v985_v30 = vpop.permute.xlu2 %984 }
0x1fa0   :  { %v987_v31 = vmul.f32 %v985_v30, %v970_v18 }
0x1fa2   :  { %997 = vrot.lane.b32.xlu0 %v987_v31, %s1132_s23 }
0x2014   :  { %v998_v32 = vpop.permute.xlu0 %997 }
0x2015   :  { %1057 = vmatmul.msk.f32.vlgmr.msrb.gmra.mxu1 %vm122_vm4, %v998_v32 }
0x2092   :  { %v1018_v34 = vpop.f32.mrf.mxu1 }
0x2093   :  { %v1019_v35 = vadd.f32 %v1064_v33, %v1018_v34 }
0x2095   :  { %1022 = vst.msk [vmem:[%s1553_s9] sm:$0xff] %vm1021_vm5, %v1019_v35 }

</bundles_post_ra>
